<compile_context>
chip_gen: v7x
topology: tpu7x:2x2x1
jax: 0.10.0
libtpu: 0.0.40
codegen_flags: <defaults>
</compile_context>

<pallas_src>
import functools

import jax
import jax.numpy as jnp
from jax import lax
from jax.experimental import pallas as pl
from jax.experimental.pallas import tpu as pltpu


# ---------------------------------------------------------------------------
# small helpers
# ---------------------------------------------------------------------------
def _round_up(x, m):
    return ((x + m - 1) // m) * m


def _pad2(a, rows, cols):
    r, c = a.shape
    return jnp.pad(a, ((0, rows - r), (0, cols - c)))


def _pad_gate_weights(w, in_dim, h, in_p, h_p):
    """(in_dim, 4*h) -> (in_p, 4*h_p); gate g's real block lands at columns
    [g*h_p, g*h_p + h) so the in-kernel gate slices stay 128-lane aligned."""
    out = jnp.zeros((in_p, 4 * h_p), w.dtype)
    for g in range(4):
        out = out.at[:in_dim, g * h_p:g * h_p + h].set(w[:, g * h:(g + 1) * h])
    return out


def _bytes(shape, dtype):
    n = 1
    for s in shape:
        n *= int(s)
    return n * jnp.dtype(dtype).itemsize


def _vmem_cap_bytes():
    """3/4 of physical VMEM: ~48 MiB on v7x (64 MiB), ~96 MiB on v5e/v6e."""
    try:
        phys = int(pltpu.get_tpu_info().vmem_capacity_bytes)
    except Exception:  # pragma: no cover - conservative fallback
        phys = 64 << 20
    return max((phys * 3) // 4, 32 << 20)


def _vmem_limit(block_bytes, scratch_bytes):
    # True need: double-buffered BlockSpec operands + resident scratch +
    # a little headroom for Mosaic internals.  Never below the 32 MiB scoped
    # default, never above 3/4 of physical VMEM.
    need = 2 * sum(block_bytes) + scratch_bytes + (2 << 20)
    return int(min(max(need, 32 << 20), _vmem_cap_bytes()))


def _choose_tile_n(n, requested):
    """Row tile: as large as requested (512 default amortizes per-step
    overhead on the mem-bound adj stream), but split in two when that would
    leave the row-parallel grid axis with a single block (v7x megacore)."""
    n128 = _round_up(n, 128)
    t = min(requested, n128)
    if n128 >= 256 and n128 // t < 2:
        t = _round_up((n128 + 1) // 2, 128)
    return t


# ---------------------------------------------------------------------------
# Support matmul:  S = X @ W   (k-tiled reduction, full output width resident)
# ---------------------------------------------------------------------------
def _matmul_kernel(x_ref, w_ref, o_ref, acc_ref):
    k = pl.program_id(1)

    @pl.when(k == 0)
    def _init():
        acc_ref[...] = jnp.zeros_like(acc_ref)

    acc_ref[...] += jnp.dot(x_ref[...], w_ref[...],
                            preferred_element_type=jnp.float32)

    @pl.when(k == pl.num_programs(1) - 1)
    def _finalize():
        o_ref[...] = acc_ref[...].astype(o_ref.dtype)


def support_matmul(x_p, w_p, *, tile_m, tile_k, out_dtype):
    m_p, k_p = x_p.shape
    n_p = w_p.shape[1]
    grid = (m_p // tile_m, k_p // tile_k)
    blk_bytes = [
        _bytes((tile_m, tile_k), x_p.dtype),
        _bytes((tile_k, n_p), w_p.dtype),
        _bytes((tile_m, n_p), out_dtype),
    ]
    scratch_bytes = _bytes((tile_m, n_p), jnp.float32)
    return pl.pallas_call(
        _matmul_kernel,
        out_shape=jax.ShapeDtypeStruct((m_p, n_p), out_dtype),
        grid_spec=pltpu.PrefetchScalarGridSpec(
            num_scalar_prefetch=0,
            grid=grid,
            in_specs=[
                pl.BlockSpec((tile_m, tile_k), lambda i, k: (i, k)),
                pl.BlockSpec((tile_k, n_p), lambda i, k: (k, 0)),
            ],
            out_specs=pl.BlockSpec((tile_m, n_p), lambda i, k: (i, 0)),
            scratch_shapes=[pltpu.VMEM((tile_m, n_p), jnp.float32)],
        ),
        compiler_params=pltpu.CompilerParams(
            dimension_semantics=("parallel", "arbitrary"),
            vmem_limit_bytes=_vmem_limit(blk_bytes, scratch_bytes),
        ),
    )(x_p, w_p)


# ---------------------------------------------------------------------------
# Aggregation:  out = (relu)(adj @ S + b)
# grid = (row-tile i, k-tile); adj tile read exactly once; full output width
# kept in the f32 VMEM accumulator (j axis collapsed).
# ---------------------------------------------------------------------------
def _aggregate_kernel(adj_ref, s_ref, b_ref, o_ref, acc_ref, *, apply_relu):
    k = pl.program_id(1)

    @pl.when(k == 0)
    def _init():
        acc_ref[...] = jnp.zeros_like(acc_ref)

    acc_ref[...] += jnp.dot(adj_ref[...], s_ref[...],
                            preferred_element_type=jnp.float32)

    @pl.when(k == pl.num_programs(1) - 1)
    def _finalize():
        out = acc_ref[...] + b_ref[...]
        if apply_relu:
            out = jnp.maximum(out, 0.0)
        o_ref[...] = out.astype(o_ref.dtype)


def gcn_aggregate(adj_p, s_p, b_p, *, tile_n, apply_relu, out_dtype):
    n_p = adj_p.shape[0]
    o_p = s_p.shape[1]
    grid = (n_p // tile_n, n_p // tile_n)
    blk_bytes = [
        _bytes((tile_n, tile_n), adj_p.dtype),
        _bytes((tile_n, o_p), s_p.dtype),
        _bytes((1, o_p), b_p.dtype),
        _bytes((tile_n, o_p), out_dtype),
    ]
    scratch_bytes = _bytes((tile_n, o_p), jnp.float32)
    kernel = functools.partial(_aggregate_kernel, apply_relu=apply_relu)
    return pl.pallas_call(
        kernel,
        out_shape=jax.ShapeDtypeStruct((n_p, o_p), out_dtype),
        grid_spec=pltpu.PrefetchScalarGridSpec(
            num_scalar_prefetch=0,
            grid=grid,
            in_specs=[
                pl.BlockSpec((tile_n, tile_n), lambda i, k: (i, k)),  # adj
                pl.BlockSpec((tile_n, o_p), lambda i, k: (k, 0)),     # S
                pl.BlockSpec((1, o_p), lambda i, k: (0, 0)),          # b
            ],
            out_specs=pl.BlockSpec((tile_n, o_p), lambda i, k: (i, 0)),
            scratch_shapes=[pltpu.VMEM((tile_n, o_p), jnp.float32)],
        ),
        compiler_params=pltpu.CompilerParams(
            dimension_semantics=("parallel", "arbitrary"),
            vmem_limit_bytes=_vmem_limit(blk_bytes, scratch_bytes),
        ),
    )(adj_p, s_p, b_p)


# ---------------------------------------------------------------------------
# Layer-2 aggregation fused with the MLP head + log_softmax.
# emb_l never touches HBM; head runs in the k-last finalize.
# ---------------------------------------------------------------------------
def _agg_head_kernel(adj_ref, s_ref, b2_ref, w1_ref, b1_ref, wf2_ref, bf2_ref,
                     *rest, mix_l, mix_g, nclass, with_global):
    if with_global:
        eg_ref, o_ref, acc_ref = rest
    else:
        o_ref, acc_ref = rest

    k = pl.program_id(1)

    @pl.when(k == 0)
    def _init():
        acc_ref[...] = jnp.zeros_like(acc_ref)

    acc_ref[...] += jnp.dot(adj_ref[...], s_ref[...],
                            preferred_element_type=jnp.float32)

    @pl.when(k == pl.num_programs(1) - 1)
    def _finalize():
        emb = acc_ref[...] + b2_ref[...]          # == embeding_l tile (f32)
        # embeding = mix_l*embeding_l + mix_g*embeding_g (constants baked in).
        if with_global:
            emb = mix_l * emb + mix_g * eg_ref[...].astype(jnp.float32)
        elif mix_l != 1.0:
            emb = mix_l * emb
        h1 = jnp.dot(emb.astype(w1_ref.dtype), w1_ref[...],
                     preferred_element_type=jnp.float32) + b1_ref[...]
        h1 = jnp.maximum(h1, 0.0)
        y = jnp.dot(h1.astype(wf2_ref.dtype), wf2_ref[...],
                    preferred_element_type=jnp.float32) + bf2_ref[...]
        # log_softmax over the real `nclass` columns only (rest is padding).
        col = lax.broadcasted_iota(jnp.int32, y.shape, 1)
        y = jnp.where(col < nclass, y, -1e30)
        m = jnp.max(y, axis=1, keepdims=True)
        z = y - m
        lse = jnp.log(jnp.sum(jnp.exp(z), axis=1, keepdims=True))
        o_ref[...] = (z - lse).astype(o_ref.dtype)


def gcn_agg_head(adj_p, s2_p, b2_p, w1_p, b1_p, wf2_p, bf2_p, emb_g_p,
                 *, mix_l, mix_g, nclass, tile_n):
    n_p = adj_p.shape[0]
    e_p = s2_p.shape[1]
    h1_p = w1_p.shape[1]
    c_p = wf2_p.shape[1]
    with_global = emb_g_p is not None
    grid = (n_p // tile_n, n_p // tile_n)

    in_specs = [
        pl.BlockSpec((tile_n, tile_n), lambda i, k: (i, k)),   # adj
        pl.BlockSpec((tile_n, e_p), lambda i, k: (k, 0)),      # S2 = h @ W_gc2
        pl.BlockSpec((1, e_p), lambda i, k: (0, 0)),           # b_gc2
        pl.BlockSpec((e_p, h1_p), lambda i, k: (0, 0)),        # W_f1
        pl.BlockSpec((1, h1_p), lambda i, k: (0, 0)),          # b_f1
        pl.BlockSpec((h1_p, c_p), lambda i, k: (0, 0)),        # W_f2
        pl.BlockSpec((1, c_p), lambda i, k: (0, 0)),           # b_f2
    ]
    args = [adj_p, s2_p, b2_p, w1_p, b1_p, wf2_p, bf2_p]
    blk_bytes = [
        _bytes((tile_n, tile_n), adj_p.dtype),
        _bytes((tile_n, e_p), s2_p.dtype),
        _bytes((1, e_p), b2_p.dtype),
        _bytes((e_p, h1_p), w1_p.dtype),
        _bytes((1, h1_p), b1_p.dtype),
        _bytes((h1_p, c_p), wf2_p.dtype),
        _bytes((1, c_p), bf2_p.dtype),
        _bytes((tile_n, c_p), jnp.float32),
    ]
    if with_global:
        in_specs.append(pl.BlockSpec((tile_n, e_p), lambda i, k: (i, 0)))
        args.append(emb_g_p)
        blk_bytes.append(_bytes((tile_n, e_p), emb_g_p.dtype))

    kernel = functools.partial(_agg_head_kernel, mix_l=mix_l, mix_g=mix_g,
                               nclass=nclass, with_global=with_global)
    return pl.pallas_call(
        kernel,
        out_shape=jax.ShapeDtypeStruct((n_p, c_p), jnp.float32),
        grid_spec=pltpu.PrefetchScalarGridSpec(
            num_scalar_prefetch=0,
            grid=grid,
            in_specs=in_specs,
            out_specs=pl.BlockSpec((tile_n, c_p), lambda i, k: (i, 0)),
            scratch_shapes=[pltpu.VMEM((tile_n, e_p), jnp.float32)],
        ),
        compiler_params=pltpu.CompilerParams(
            dimension_semantics=("parallel", "arbitrary"),
            vmem_limit_bytes=_vmem_limit(
                blk_bytes, _bytes((tile_n, e_p), jnp.float32)),
        ),
    )(*args)


# ---------------------------------------------------------------------------
# Single-layer LSTM (returns final hidden state h_T per node).
# Grid over node tiles (independent recurrences).  Gate weights are
# concatenated (i, f, g, o); the input projection is hoisted out of the
# recurrence into one big MXU GEMM held in VMEM scratch (compute dtype).
# ---------------------------------------------------------------------------
def _lstm_kernel(walks_ref, wx_ref, wh_ref, b_ref, h_out_ref, xw_ref, *, hidden_p):
    seq_len, tm, f_p = walks_ref.shape
    hp = hidden_p

    # Hoisted input projection: one (T*tm, F) @ (F, 4H) MXU GEMM, bias folded.
    x2 = walks_ref[...].reshape(seq_len * tm, f_p)
    xw_ref[...] = (jnp.dot(x2, wx_ref[...], preferred_element_type=jnp.float32)
                   + b_ref[...]).astype(xw_ref.dtype)

    wh = wh_ref[...]
    h0 = jnp.zeros((tm, hp), jnp.float32)
    c0 = jnp.zeros((tm, hp), jnp.float32)

    def step(t, carry):
        h, c = carry
        row = pl.multiple_of(t * tm, 8)
        g = (xw_ref[pl.ds(row, tm), :].astype(jnp.float32)
             + jnp.dot(h.astype(wh.dtype), wh,
                       preferred_element_type=jnp.float32))
        i = jax.nn.sigmoid(g[:, 0 * hp:1 * hp])
        f = jax.nn.sigmoid(g[:, 1 * hp:2 * hp])
        gg = jnp.tanh(g[:, 2 * hp:3 * hp])
        o = jax.nn.sigmoid(g[:, 3 * hp:4 * hp])
        c_new = f * c + i * gg
        h_new = o * jnp.tanh(c_new)
        return h_new, c_new

    h_fin, _ = lax.fori_loop(0, seq_len, step, (h0, c0), unroll=True)
    h_out_ref[...] = h_fin.astype(h_out_ref.dtype)


def lstm_last_hidden(walks_p, wx_p, wh_p, b_p, *, tile_n, hidden_p):
    seq_len, n_p, f_p = walks_p.shape
    gates_p = wx_p.shape[1]
    grid = (n_p // tile_n,)

    blk_bytes = [
        _bytes((seq_len, tile_n, f_p), walks_p.dtype),
        _bytes(wx_p.shape, wx_p.dtype),
        _bytes(wh_p.shape, wh_p.dtype),
        _bytes(b_p.shape, b_p.dtype),
        _bytes((tile_n, hidden_p), jnp.float32),
    ]
    scratch_bytes = _bytes((seq_len * tile_n, gates_p), walks_p.dtype)
    kernel = functools.partial(_lstm_kernel, hidden_p=hidden_p)
    return pl.pallas_call(
        kernel,
        out_shape=jax.ShapeDtypeStruct((n_p, hidden_p), jnp.float32),
        grid_spec=pltpu.PrefetchScalarGridSpec(
            num_scalar_prefetch=0,
            grid=grid,
            in_specs=[
                pl.BlockSpec((seq_len, tile_n, f_p), lambda i: (0, i, 0)),
                pl.BlockSpec(wx_p.shape, lambda i: (0, 0)),
                pl.BlockSpec(wh_p.shape, lambda i: (0, 0)),
                pl.BlockSpec(b_p.shape, lambda i: (0, 0)),
            ],
            out_specs=pl.BlockSpec((tile_n, hidden_p), lambda i: (i, 0)),
            scratch_shapes=[
                pltpu.VMEM((seq_len * tile_n, gates_p), walks_p.dtype)],
        ),
        compiler_params=pltpu.CompilerParams(
            dimension_semantics=("parallel",),
            vmem_limit_bytes=_vmem_limit(blk_bytes, scratch_bytes),
        ),
    )(walks_p, wx_p, wh_p, b_p)


# ---------------------------------------------------------------------------
# Adjacency preparation — done ONCE, outside the jitted forward (adj is
# usually static across steps; padding + bf16 cast per call would cost about
# a whole extra GCN layer of HBM traffic on an adj-bandwidth-bound kernel).
# ---------------------------------------------------------------------------
def pad_adjacency(adj, *, tile_n=512, compute_dtype=jnp.bfloat16):
    n = adj.shape[0]
    t_n = _choose_tile_n(n, tile_n)
    n_p = _round_up(n, t_n)
    return _pad2(adj, n_p, n_p).astype(compute_dtype)


# ---------------------------------------------------------------------------
# Full GCN forward pass (takes the pre-padded adjacency)
# ---------------------------------------------------------------------------
def gcn_forward(x, adj_p, walks, p, *, mix_l=1.0, mix_g=0.0, run_lstm=None,
                compute_dtype=jnp.bfloat16, tile_n=512):
    """mix_l / mix_g mirror `1*embeding_l + 0*embeding_g` in the reference.
    With mix_g == 0 the LSTM branch is dead compute and is skipped entirely
    (set run_lstm=True to force the literal arithmetic).
    adj_p must come from pad_adjacency(adj, tile_n=tile_n, ...)."""
    if run_lstm is None:
        run_lstm = (mix_g != 0.0)

    n, nfeat = x.shape
    nhid = p["w_gc1"].shape[1]
    nembed = p["w_gc2"].shape[1]
    nhead = p["w_f1"].shape[1]
    nclass = p["w_f2"].shape[1]
    cd = compute_dtype

    t_n = _choose_tile_n(n, tile_n)
    n_p = _round_up(n, t_n)
    assert adj_p.shape == (n_p, n_p), (
        f"adj_p {adj_p.shape} does not match padded size {(n_p, n_p)}; "
        f"pad with pad_adjacency(adj, tile_n={tile_n})")
    assert adj_p.dtype == jnp.dtype(cd), "adj_p dtype must match compute_dtype"

    tk_f = min(512, _round_up(nfeat, 128))     # reduction tile over nfeat
    f_p = _round_up(nfeat, tk_f)
    tk_h = min(512, _round_up(nhid, 128))      # reduction tile over nhid
    hh_p = _round_up(nhid, tk_h)
    e_p = _round_up(nembed, 128)
    h1_p = _round_up(nhead, 128)
    c_p = _round_up(nclass, 128)

    # Pad + cast (small relative to adj); padding sliced off at the end.
    x_p = _pad2(x, n_p, f_p).astype(cd)
    w1_p = _pad2(p["w_gc1"], f_p, hh_p).astype(cd)
    b1_p = _pad2(p["b_gc1"], 1, hh_p).astype(jnp.float32)
    w2_p = _pad2(p["w_gc2"], hh_p, e_p).astype(cd)
    b2_p = _pad2(p["b_gc2"], 1, e_p).astype(jnp.float32)
    wf1_p = _pad2(p["w_f1"], e_p, h1_p).astype(cd)
    bf1_p = _pad2(p["b_f1"], 1, h1_p).astype(jnp.float32)
    wf2_p = _pad2(p["w_f2"], h1_p, c_p).astype(cd)
    bf2_p = _pad2(p["b_f2"], 1, c_p).astype(jnp.float32)

    # ---- Layer 1: support computed once, then relu(adj @ S1 + b1) ----
    s1_p = support_matmul(x_p, w1_p, tile_m=t_n, tile_k=tk_f, out_dtype=cd)
    h_p = gcn_aggregate(adj_p, s1_p, b1_p, tile_n=t_n, apply_relu=True,
                        out_dtype=cd)
    # TODO(synk): F.dropout reproduced with eval semantics (identity);
    # training-mode stochastic dropout is not replicated.

    # ---- Optional LSTM branch (dead in the reference: mix_g == 0) ----
    emb_g_p = None
    if run_lstm:
        seq_len = walks.shape[1]
        walks_tm = jnp.transpose(walks, (1, 0, 2))          # time-major (T,N,F)
        walks_p = jnp.pad(
            walks_tm, ((0, 0), (0, n_p - n), (0, f_p - nfeat))).astype(cd)
        wx_p = _pad_gate_weights(p["lstm_wx"], nfeat, nembed, f_p, e_p).astype(cd)
        wh_p = _pad_gate_weights(p["lstm_wh"], nembed, nembed, e_p, e_p).astype(cd)
        bl_p = _pad_gate_weights(p["lstm_b"], 1, nembed, 1, e_p).astype(jnp.float32)
        emb_g_p = lstm_last_hidden(walks_p, wx_p, wh_p, bl_p,
                                   tile_n=t_n, hidden_p=e_p)

    # ---- Layer 2 support once, then fused aggregation + MLP head ----
    s2_p = support_matmul(h_p, w2_p, tile_m=t_n, tile_k=tk_h, out_dtype=cd)
    out_p = gcn_agg_head(adj_p, s2_p, b2_p, wf1_p, bf1_p, wf2_p, bf2_p,
                         emb_g_p, mix_l=mix_l, mix_g=mix_g, nclass=nclass,
                         tile_n=t_n)
    return out_p[:n, :nclass]


# ---------------------------------------------------------------------------
# Pure-JAX reference (same semantics as the PyTorch module, eval mode)
# ---------------------------------------------------------------------------
def gcn_forward_ref(x, adj, walks, p, *, mix_l=1.0, mix_g=0.0):
    pr = lax.Precision.HIGHEST

    def mm(a, b):
        return jnp.dot(a, b, precision=pr)

    def sig(v):
        return 1.0 / (1.0 + jnp.exp(-v))

    h = jnp.maximum(mm(adj, mm(x, p["w_gc1"])) + p["b_gc1"], 0.0)
    emb_l = mm(adj, mm(h, p["w_gc2"])) + p["b_gc2"]

    n, t, _ = walks.shape
    nembed = p["w_gc2"].shape[1]
    hc = jnp.zeros((n, nembed), jnp.float32)
    cc = jnp.zeros((n, nembed), jnp.float32)
    for tt in range(t):
        g = mm(walks[:, tt, :], p["lstm_wx"]) + mm(hc, p["lstm_wh"]) + p["lstm_b"]
        i = sig(g[:, 0 * nembed:1 * nembed])
        f = sig(g[:, 1 * nembed:2 * nembed])
        gg = jnp.tanh(g[:, 2 * nembed:3 * nembed])
        o = sig(g[:, 3 * nembed:4 * nembed])
        cc = f * cc + i * gg
        hc = o * jnp.tanh(cc)

    emb = mix_l * emb_l + mix_g * hc
    y = jnp.maximum(mm(emb, p["w_f1"]) + p["b_f1"], 0.0)
    y = mm(y, p["w_f2"]) + p["b_f2"]
    return jax.nn.log_softmax(y, axis=1)


def make_params(key, nfeat, nhid, nembed, nclass, scale=0.5):
    ks = jax.random.split(key, 11)

    def u(k, shape):
        return jax.random.uniform(k, shape, jnp.float32, -scale, scale)

    return {
        # GraphConvolution weights: (in, out); bias broadcastable (1, out).
        "w_gc1": u(ks[0], (nfeat, nhid)),
        "b_gc1": u(ks[1], (1, nhid)),
        "w_gc2": u(ks[2], (nhid, nembed)),
        "b_gc2": u(ks[3], (1, nembed)),
        # MLP head (Linear weights pre-transposed to (in, out)).
        "w_f1": u(ks[4], (nembed, 8)),
        "b_f1": u(ks[5], (1, 8)),
        "w_f2": u(ks[6], (8, nclass)),
        "b_f2": u(ks[7], (1, nclass)),
        # LSTM(nfeat, nembed): gate-concatenated (i,f,g,o, PyTorch order),
        # pre-transposed to (in, 4H); b = b_ih + b_hh pre-summed.
        "lstm_wx": u(ks[8], (nfeat, 4 * nembed)),
        "lstm_wh": u(ks[9], (nembed, 4 * nembed)),
        "lstm_b": u(ks[10], (1, 4 * nembed)),
    }


if __name__ == "__main__":
    N, nfeat, nhid, nembed, nclass, T = 8, 16, 32, 16, 4, 8
    TILE = 512

    key = jax.random.PRNGKey(0)
    k_x, k_adj, k_walks, k_params = jax.random.split(key, 4)

    x = jax.random.normal(k_x, (N, nfeat), jnp.float32)
    adj = jax.random.uniform(k_adj, (N, N), jnp.float32)
    adj = adj / jnp.sum(adj, axis=1, keepdims=True)     # row-normalized adjacency
    walks = jax.random.normal(k_walks, (N, T, nfeat), jnp.float32)
    params = make_params(k_params, nfeat, nhid, nembed, nclass)

    # Default path: identical semantics to the reference (1*emb_l + 0*emb_g),
    # so the dead LSTM branch is skipped; bf16 MXU inputs, f32 accumulation.
    # adj padding/casting is hoisted out of the jitted forward (done once).
    adj_p_bf16 = pad_adjacency(adj, tile_n=TILE, compute_dtype=jnp.bfloat16)
    fwd = jax.jit(functools.partial(gcn_forward, tile_n=TILE))
    out = fwd(x, adj_p_bf16, walks, params)
    jax.block_until_ready(out)
    assert out.shape == (N, nclass)
    assert bool(jnp.all(jnp.isfinite(out)))

    ref = gcn_forward_ref(x, adj, walks, params)
    assert jnp.allclose(out, ref, atol=5e-2, rtol=5e-2), "bf16 path mismatch"

    # Exercise the optional LSTM branch + mixing path (f32) and check it
    # against the pure-JAX reference with the same mix coefficients.
    adj_p_f32 = pad_adjacency(adj, tile_n=TILE, compute_dtype=jnp.float32)
    fwd_mix = jax.jit(functools.partial(gcn_forward, mix_l=1.0, mix_g=1.0,
                                        compute_dtype=jnp.float32,
                                        tile_n=TILE))
    out_mix = fwd_mix(x, adj_p_f32, walks, params)
    jax.block_until_ready(out_mix)
    ref_mix = gcn_forward_ref(x, adj, walks, params, mix_l=1.0, mix_g=1.0)
    assert jnp.allclose(out_mix, ref_mix, atol=5e-2, rtol=5e-2), "LSTM path mismatch"

    print("KERNEL_OK")
</pallas_src>

<mosaic_0001>
module attributes {stable_mosaic.version = 11 : i64} {
  func.func @_matmul_kernel(%arg0: i32, %arg1: i32, %arg2: memref<128x128xbf16, #tpu.memory_space<vmem>>, %arg3: memref<128x128xbf16, #tpu.memory_space<vmem>>, %arg4: memref<128x128xbf16, #tpu.memory_space<vmem>>, %arg5: memref<128x128xf32, #tpu.memory_space<vmem>>) attributes {dimension_semantics = [#tpu.dimension_semantics<parallel>, #tpu.dimension_semantics<arbitrary>], iteration_bounds = array<i64: 1, 1>, scalar_prefetch = 0 : i64, scratch_operands = 1 : i64, tpu.core_type = #tpu.core_type<tc>, window_params = [{transform_indices = @transform_0, window_bounds = array<i64: 128, 128>}, {transform_indices = @transform_1, window_bounds = array<i64: 128, 128>}, {transform_indices = @transform_2, window_bounds = array<i64: 128, 128>}]} {
    %c0_i32 = arith.constant 0 : i32
    %0 = arith.cmpi eq, %arg1, %c0_i32 : i32
    %1 = arith.extui %0 : i1 to i32
    %c0_i32_0 = arith.constant 0 : i32
    %2 = arith.cmpi ne, %1, %c0_i32_0 : i32
    scf.if %2 {
      %cst_10 = arith.constant 0.000000e+00 : f32
      %12 = vector.broadcast %cst_10 : f32 to vector<128x128xf32>
      %c0_11 = arith.constant 0 : index
      %c0_12 = arith.constant 0 : index
      %13 = vector.load %arg5[%c0_11, %c0_12] : memref<128x128xf32, #tpu.memory_space<vmem>>, vector<128x128xf32>
      tpu.vector_store %arg5[%c0_11, %c0_12], %12 {strides = array<i32>} : memref<128x128xf32, #tpu.memory_space<vmem>>, vector<128x128xf32>,
    } else {
    }
    %c0 = arith.constant 0 : index
    %c0_1 = arith.constant 0 : index
    %3 = vector.load %arg5[%c0, %c0_1] : memref<128x128xf32, #tpu.memory_space<vmem>>, vector<128x128xf32>
    %c0_2 = arith.constant 0 : index
    %c0_3 = arith.constant 0 : index
    %4 = vector.load %arg2[%c0_2, %c0_3] : memref<128x128xbf16, #tpu.memory_space<vmem>>, vector<128x128xbf16>
    %c0_4 = arith.constant 0 : index
    %c0_5 = arith.constant 0 : index
    %5 = vector.load %arg3[%c0_4, %c0_5] : memref<128x128xbf16, #tpu.memory_space<vmem>>, vector<128x128xbf16>
    %cst = arith.constant dense<0.000000e+00> : vector<128x128xf32>
    %6 = tpu.matmul %4, %5, %cst {dimension_numbers = #tpu.dot_dimension_numbers<[1], [0], [0], [1], [0, 0, 1, 1], [], []>} : vector<128x128xbf16>, vector<128x128xbf16>, vector<128x128xf32> -> vector<128x128xf32>
    %7 = arith.addf %3, %6 : vector<128x128xf32>
    %c0_6 = arith.constant 0 : index
    %c0_7 = arith.constant 0 : index
    %8 = vector.load %arg5[%c0_6, %c0_7] : memref<128x128xf32, #tpu.memory_space<vmem>>, vector<128x128xf32>
    tpu.vector_store %arg5[%c0_6, %c0_7], %7 {strides = array<i32>} : memref<128x128xf32, #tpu.memory_space<vmem>>, vector<128x128xf32>,
    %c0_i32_8 = arith.constant 0 : i32
    %9 = arith.cmpi eq, %arg1, %c0_i32_8 : i32
    %10 = arith.extui %9 : i1 to i32
    %c0_i32_9 = arith.constant 0 : i32
    %11 = arith.cmpi ne, %10, %c0_i32_9 : i32
    scf.if %11 {
      %c0_10 = arith.constant 0 : index
      %c0_11 = arith.constant 0 : index
      %12 = vector.load %arg5[%c0_10, %c0_11] : memref<128x128xf32, #tpu.memory_space<vmem>>, vector<128x128xf32>
      %13 = arith.truncf %12 : vector<128x128xf32> to vector<128x128xbf16>
      %c0_12 = arith.constant 0 : index
      %c0_13 = arith.constant 0 : index
      %14 = vector.load %arg4[%c0_12, %c0_13] : memref<128x128xbf16, #tpu.memory_space<vmem>>, vector<128x128xbf16>
      tpu.vector_store %arg4[%c0_12, %c0_13], %13 {strides = array<i32>} : memref<128x128xbf16, #tpu.memory_space<vmem>>, vector<128x128xbf16>,
    } else {
    }
    return
  }
  func.func @transform_0(%arg0: i32, %arg1: i32) -> (i32, i32) {
    %c0_i32 = arith.constant 0 : i32
    return %arg0, %arg1 : i32, i32
  }
  func.func @transform_1(%arg0: i32, %arg1: i32) -> (i32, i32) {
    %c0_i32 = arith.constant 0 : i32
    %c0_i32_0 = arith.constant 0 : i32
    return %arg1, %c0_i32 : i32, i32
  }
  func.func @transform_2(%arg0: i32, %arg1: i32) -> (i32, i32) {
    %c0_i32 = arith.constant 0 : i32
    %c0_i32_0 = arith.constant 0 : i32
    return %arg0, %c0_i32 : i32, i32
  }
}

module attributes {stable_mosaic.version = 11 : i64} {
  func.func @_aggregate_kernel(%arg0: i32, %arg1: i32, %arg2: memref<128x128xbf16, #tpu.memory_space<vmem>>, %arg3: memref<128x128xbf16, #tpu.memory_space<vmem>>, %arg4: memref<1x128xf32, #tpu.memory_space<vmem>>, %arg5: memref<128x128xbf16, #tpu.memory_space<vmem>>, %arg6: memref<128x128xf32, #tpu.memory_space<vmem>>) attributes {dimension_semantics = [#tpu.dimension_semantics<parallel>, #tpu.dimension_semantics<arbitrary>], iteration_bounds = array<i64: 1, 1>, scalar_prefetch = 0 : i64, scratch_operands = 1 : i64, tpu.core_type = #tpu.core_type<tc>, window_params = [{transform_indices = @transform_0, window_bounds = array<i64: 128, 128>}, {transform_indices = @transform_1, window_bounds = array<i64: 128, 128>}, {pipeline_mode = #tpu.pipeline_mode<synchronous>, transform_indices = @transform_2, window_bounds = array<i64: 1, 128>}, {transform_indices = @transform_3, window_bounds = array<i64: 128, 128>}]} {
    %c0_i32 = arith.constant 0 : i32
    %0 = arith.cmpi eq, %arg1, %c0_i32 : i32
    %1 = arith.extui %0 : i1 to i32
    %c0_i32_0 = arith.constant 0 : i32
    %2 = arith.cmpi ne, %1, %c0_i32_0 : i32
    scf.if %2 {
      %cst_10 = arith.constant 0.000000e+00 : f32
      %12 = vector.broadcast %cst_10 : f32 to vector<128x128xf32>
      %c0_11 = arith.constant 0 : index
      %c0_12 = arith.constant 0 : index
      %13 = vector.load %arg6[%c0_11, %c0_12] : memref<128x128xf32, #tpu.memory_space<vmem>>, vector<128x128xf32>
      tpu.vector_store %arg6[%c0_11, %c0_12], %12 {strides = array<i32>} : memref<128x128xf32, #tpu.memory_space<vmem>>, vector<128x128xf32>,
    } else {
    }
    %c0 = arith.constant 0 : index
    %c0_1 = arith.constant 0 : index
    %3 = vector.load %arg6[%c0, %c0_1] : memref<128x128xf32, #tpu.memory_space<vmem>>, vector<128x128xf32>
    %c0_2 = arith.constant 0 : index
    %c0_3 = arith.constant 0 : index
    %4 = vector.load %arg2[%c0_2, %c0_3] : memref<128x128xbf16, #tpu.memory_space<vmem>>, vector<128x128xbf16>
    %c0_4 = arith.constant 0 : index
    %c0_5 = arith.constant 0 : index
    %5 = vector.load %arg3[%c0_4, %c0_5] : memref<128x128xbf16, #tpu.memory_space<vmem>>, vector<128x128xbf16>
    %cst = arith.constant dense<0.000000e+00> : vector<128x128xf32>
    %6 = tpu.matmul %4, %5, %cst {dimension_numbers = #tpu.dot_dimension_numbers<[1], [0], [0], [1], [0, 0, 1, 1], [], []>} : vector<128x128xbf16>, vector<128x128xbf16>, vector<128x128xf32> -> vector<128x128xf32>
    %7 = arith.addf %3, %6 : vector<128x128xf32>
    %c0_6 = arith.constant 0 : index
    %c0_7 = arith.constant 0 : index
    %8 = vector.load %arg6[%c0_6, %c0_7] : memref<128x128xf32, #tpu.memory_space<vmem>>, vector<128x128xf32>
    tpu.vector_store %arg6[%c0_6, %c0_7], %7 {strides = array<i32>} : memref<128x128xf32, #tpu.memory_space<vmem>>, vector<128x128xf32>,
    %c0_i32_8 = arith.constant 0 : i32
    %9 = arith.cmpi eq, %arg1, %c0_i32_8 : i32
    %10 = arith.extui %9 : i1 to i32
    %c0_i32_9 = arith.constant 0 : i32
    %11 = arith.cmpi ne, %10, %c0_i32_9 : i32
    scf.if %11 {
      %c0_10 = arith.constant 0 : index
      %c0_11 = arith.constant 0 : index
      %12 = vector.load %arg6[%c0_10, %c0_11] : memref<128x128xf32, #tpu.memory_space<vmem>>, vector<128x128xf32>
      %c0_12 = arith.constant 0 : index
      %c0_13 = arith.constant 0 : index
      %13 = vector.load %arg4[%c0_12, %c0_13] : memref<1x128xf32, #tpu.memory_space<vmem>>, vector<1x128xf32>
      %14 = vector.broadcast %13 : vector<1x128xf32> to vector<128x128xf32>
      %15 = arith.addf %12, %14 : vector<128x128xf32>
      %cst_14 = arith.constant 0.000000e+00 : f32
      %16 = vector.broadcast %cst_14 : f32 to vector<128x128xf32>
      %17 = arith.maximumf %15, %16 : vector<128x128xf32>
      %18 = arith.truncf %17 : vector<128x128xf32> to vector<128x128xbf16>
      %c0_15 = arith.constant 0 : index
      %c0_16 = arith.constant 0 : index
      %19 = vector.load %arg5[%c0_15, %c0_16] : memref<128x128xbf16, #tpu.memory_space<vmem>>, vector<128x128xbf16>
      tpu.vector_store %arg5[%c0_15, %c0_16], %18 {strides = array<i32>} : memref<128x128xbf16, #tpu.memory_space<vmem>>, vector<128x128xbf16>,
    } else {
    }
    return
  }
  func.func @transform_0(%arg0: i32, %arg1: i32) -> (i32, i32) {
    %c0_i32 = arith.constant 0 : i32
    return %arg0, %arg1 : i32, i32
  }
  func.func @transform_1(%arg0: i32, %arg1: i32) -> (i32, i32) {
    %c0_i32 = arith.constant 0 : i32
    %c0_i32_0 = arith.constant 0 : i32
    return %arg1, %c0_i32 : i32, i32
  }
  func.func @transform_2(%arg0: i32, %arg1: i32) -> (i32, i32) {
    %c0_i32 = arith.constant 0 : i32
    %c0_i32_0 = arith.constant 0 : i32
    %c0_i32_1 = arith.constant 0 : i32
    return %c0_i32, %c0_i32_0 : i32, i32
  }
  func.func @transform_3(%arg0: i32, %arg1: i32) -> (i32, i32) {
    %c0_i32 = arith.constant 0 : i32
    %c0_i32_0 = arith.constant 0 : i32
    return %arg0, %c0_i32 : i32, i32
  }
}

module attributes {stable_mosaic.version = 11 : i64} {
  func.func @_agg_head_kernel(%arg0: i32, %arg1: i32, %arg2: memref<128x128xbf16, #tpu.memory_space<vmem>>, %arg3: memref<128x128xbf16, #tpu.memory_space<vmem>>, %arg4: memref<1x128xf32, #tpu.memory_space<vmem>>, %arg5: memref<128x128xbf16, #tpu.memory_space<vmem>>, %arg6: memref<1x128xf32, #tpu.memory_space<vmem>>, %arg7: memref<128x128xbf16, #tpu.memory_space<vmem>>, %arg8: memref<1x128xf32, #tpu.memory_space<vmem>>, %arg9: memref<128x128xf32, #tpu.memory_space<vmem>>, %arg10: memref<128x128xf32, #tpu.memory_space<vmem>>) attributes {dimension_semantics = [#tpu.dimension_semantics<parallel>, #tpu.dimension_semantics<arbitrary>], iteration_bounds = array<i64: 1, 1>, scalar_prefetch = 0 : i64, scratch_operands = 1 : i64, tpu.core_type = #tpu.core_type<tc>, window_params = [{transform_indices = @transform_0, window_bounds = array<i64: 128, 128>}, {transform_indices = @transform_1, window_bounds = array<i64: 128, 128>}, {pipeline_mode = #tpu.pipeline_mode<synchronous>, transform_indices = @transform_2, window_bounds = array<i64: 1, 128>}, {pipeline_mode = #tpu.pipeline_mode<synchronous>, transform_indices = @transform_3, window_bounds = array<i64: 128, 128>}, {pipeline_mode = #tpu.pipeline_mode<synchronous>, transform_indices = @transform_4, window_bounds = array<i64: 1, 128>}, {pipeline_mode = #tpu.pipeline_mode<synchronous>, transform_indices = @transform_5, window_bounds = array<i64: 128, 128>}, {pipeline_mode = #tpu.pipeline_mode<synchronous>, transform_indices = @transform_6, window_bounds = array<i64: 1, 128>}, {transform_indices = @transform_7, window_bounds = array<i64: 128, 128>}]} {
    %c0_i32 = arith.constant 0 : i32
    %0 = arith.cmpi eq, %arg1, %c0_i32 : i32
    %1 = arith.extui %0 : i1 to i32
    %c0_i32_0 = arith.constant 0 : i32
    %2 = arith.cmpi ne, %1, %c0_i32_0 : i32
    scf.if %2 {
      %cst_10 = arith.constant 0.000000e+00 : f32
      %12 = vector.broadcast %cst_10 : f32 to vector<128x128xf32>
      %c0_11 = arith.constant 0 : index
      %c0_12 = arith.constant 0 : index
      %13 = vector.load %arg10[%c0_11, %c0_12] : memref<128x128xf32, #tpu.memory_space<vmem>>, vector<128x128xf32>
      tpu.vector_store %arg10[%c0_11, %c0_12], %12 {strides = array<i32>} : memref<128x128xf32, #tpu.memory_space<vmem>>, vector<128x128xf32>,
    } else {
    }
    %c0 = arith.constant 0 : index
    %c0_1 = arith.constant 0 : index
    %3 = vector.load %arg10[%c0, %c0_1] : memref<128x128xf32, #tpu.memory_space<vmem>>, vector<128x128xf32>
    %c0_2 = arith.constant 0 : index
    %c0_3 = arith.constant 0 : index
    %4 = vector.load %arg2[%c0_2, %c0_3] : memref<128x128xbf16, #tpu.memory_space<vmem>>, vector<128x128xbf16>
    %c0_4 = arith.constant 0 : index
    %c0_5 = arith.constant 0 : index
    %5 = vector.load %arg3[%c0_4, %c0_5] : memref<128x128xbf16, #tpu.memory_space<vmem>>, vector<128x128xbf16>
    %cst = arith.constant dense<0.000000e+00> : vector<128x128xf32>
    %6 = tpu.matmul %4, %5, %cst {dimension_numbers = #tpu.dot_dimension_numbers<[1], [0], [0], [1], [0, 0, 1, 1], [], []>} : vector<128x128xbf16>, vector<128x128xbf16>, vector<128x128xf32> -> vector<128x128xf32>
    %7 = arith.addf %3, %6 : vector<128x128xf32>
    %c0_6 = arith.constant 0 : index
    %c0_7 = arith.constant 0 : index
    %8 = vector.load %arg10[%c0_6, %c0_7] : memref<128x128xf32, #tpu.memory_space<vmem>>, vector<128x128xf32>
    tpu.vector_store %arg10[%c0_6, %c0_7], %7 {strides = array<i32>} : memref<128x128xf32, #tpu.memory_space<vmem>>, vector<128x128xf32>,
    %c0_i32_8 = arith.constant 0 : i32
    %9 = arith.cmpi eq, %arg1, %c0_i32_8 : i32
    %10 = arith.extui %9 : i1 to i32
    %c0_i32_9 = arith.constant 0 : i32
    %11 = arith.cmpi ne, %10, %c0_i32_9 : i32
    scf.if %11 {
      %c0_10 = arith.constant 0 : index
      %c0_11 = arith.constant 0 : index
      %12 = vector.load %arg10[%c0_10, %c0_11] : memref<128x128xf32, #tpu.memory_space<vmem>>, vector<128x128xf32>
      %c0_12 = arith.constant 0 : index
      %c0_13 = arith.constant 0 : index
      %13 = vector.load %arg4[%c0_12, %c0_13] : memref<1x128xf32, #tpu.memory_space<vmem>>, vector<1x128xf32>
      %14 = vector.broadcast %13 : vector<1x128xf32> to vector<128x128xf32>
      %15 = arith.addf %12, %14 : vector<128x128xf32>
      %16 = arith.truncf %15 : vector<128x128xf32> to vector<128x128xbf16>
      %c0_14 = arith.constant 0 : index
      %c0_15 = arith.constant 0 : index
      %17 = vector.load %arg5[%c0_14, %c0_15] : memref<128x128xbf16, #tpu.memory_space<vmem>>, vector<128x128xbf16>
      %cst_16 = arith.constant dense<0.000000e+00> : vector<128x128xf32>
      %18 = tpu.matmul %16, %17, %cst_16 {dimension_numbers = #tpu.dot_dimension_numbers<[1], [0], [0], [1], [0, 0, 1, 1], [], []>} : vector<128x128xbf16>, vector<128x128xbf16>, vector<128x128xf32> -> vector<128x128xf32>
      %c0_17 = arith.constant 0 : index
      %c0_18 = arith.constant 0 : index
      %19 = vector.load %arg6[%c0_17, %c0_18] : memref<1x128xf32, #tpu.memory_space<vmem>>, vector<1x128xf32>
      %20 = vector.broadcast %19 : vector<1x128xf32> to vector<128x128xf32>
      %21 = arith.addf %18, %20 : vector<128x128xf32>
      %cst_19 = arith.constant 0.000000e+00 : f32
      %22 = vector.broadcast %cst_19 : f32 to vector<128x128xf32>
      %23 = arith.maximumf %21, %22 : vector<128x128xf32>
      %24 = arith.truncf %23 : vector<128x128xf32> to vector<128x128xbf16>
      %c0_20 = arith.constant 0 : index
      %c0_21 = arith.constant 0 : index
      %25 = vector.load %arg7[%c0_20, %c0_21] : memref<128x128xbf16, #tpu.memory_space<vmem>>, vector<128x128xbf16>
      %cst_22 = arith.constant dense<0.000000e+00> : vector<128x128xf32>
      %26 = tpu.matmul %24, %25, %cst_22 {dimension_numbers = #tpu.dot_dimension_numbers<[1], [0], [0], [1], [0, 0, 1, 1], [], []>} : vector<128x128xbf16>, vector<128x128xbf16>, vector<128x128xf32> -> vector<128x128xf32>
      %c0_23 = arith.constant 0 : index
      %c0_24 = arith.constant 0 : index
      %27 = vector.load %arg8[%c0_23, %c0_24] : memref<1x128xf32, #tpu.memory_space<vmem>>, vector<1x128xf32>
      %28 = vector.broadcast %27 : vector<1x128xf32> to vector<128x128xf32>
      %29 = arith.addf %26, %28 : vector<128x128xf32>
      %30 = tpu.iota {dimensions = array<i32: 1>} : vector<128x128xi32>
      %c4_i32 = arith.constant 4 : i32
      %31 = vector.broadcast %c4_i32 : i32 to vector<128x128xi32>
      %32 = arith.cmpi slt, %30, %31 : vector<128x128xi32>
      %cst_25 = arith.constant -1.000000e+30 : f32
      %33 = vector.broadcast %cst_25 : f32 to vector<128x128xf32>
      %34 = arith.select %32, %29, %33 : vector<128x128xi1>, vector<128x128xf32>
      %cst_26 = arith.constant dense<0xFF800000> : vector<128xf32>
      %35 = vector.multi_reduction <maximumf>, %34, %cst_26 [1] : vector<128x128xf32> to vector<128xf32>
      %36 = vector.shape_cast %35 : vector<128xf32> to vector<128x1xf32>
      %37 = vector.broadcast %36 : vector<128x1xf32> to vector<128x128xf32>
      %38 = arith.subf %34, %37 : vector<128x128xf32>
      %39 = math.exp %38 : vector<128x128xf32>
      %cst_27 = arith.constant dense<0.000000e+00> : vector<128xf32>
      %40 = vector.multi_reduction <add>, %39, %cst_27 [1] : vector<128x128xf32> to vector<128xf32>
      %41 = vector.shape_cast %40 : vector<128xf32> to vector<128x1xf32>
      %42 = math.log %41 : vector<128x1xf32>
      %43 = vector.broadcast %42 : vector<128x1xf32> to vector<128x128xf32>
      %44 = arith.subf %38, %43 : vector<128x128xf32>
      %c0_28 = arith.constant 0 : index
      %c0_29 = arith.constant 0 : index
      %45 = vector.load %arg9[%c0_28, %c0_29] : memref<128x128xf32, #tpu.memory_space<vmem>>, vector<128x128xf32>
      tpu.vector_store %arg9[%c0_28, %c0_29], %44 {strides = array<i32>} : memref<128x128xf32, #tpu.memory_space<vmem>>, vector<128x128xf32>,
    } else {
    }
    return
  }
  func.func @transform_0(%arg0: i32, %arg1: i32) -> (i32, i32) {
    %c0_i32 = arith.constant 0 : i32
    return %arg0, %arg1 : i32, i32
  }
  func.func @transform_1(%arg0: i32, %arg1: i32) -> (i32, i32) {
    %c0_i32 = arith.constant 0 : i32
    %c0_i32_0 = arith.constant 0 : i32
    return %arg1, %c0_i32 : i32, i32
  }
  func.func @transform_2(%arg0: i32, %arg1: i32) -> (i32, i32) {
    %c0_i32 = arith.constant 0 : i32
    %c0_i32_0 = arith.constant 0 : i32
    %c0_i32_1 = arith.constant 0 : i32
    return %c0_i32, %c0_i32_0 : i32, i32
  }
  func.func @transform_3(%arg0: i32, %arg1: i32) -> (i32, i32) {
    %c0_i32 = arith.constant 0 : i32
    %c0_i32_0 = arith.constant 0 : i32
    %c0_i32_1 = arith.constant 0 : i32
    return %c0_i32, %c0_i32_0 : i32, i32
  }
  func.func @transform_4(%arg0: i32, %arg1: i32) -> (i32, i32) {
    %c0_i32 = arith.constant 0 : i32
    %c0_i32_0 = arith.constant 0 : i32
    %c0_i32_1 = arith.constant 0 : i32
    return %c0_i32, %c0_i32_0 : i32, i32
  }
  func.func @transform_5(%arg0: i32, %arg1: i32) -> (i32, i32) {
    %c0_i32 = arith.constant 0 : i32
    %c0_i32_0 = arith.constant 0 : i32
    %c0_i32_1 = arith.constant 0 : i32
    return %c0_i32, %c0_i32_0 : i32, i32
  }
  func.func @transform_6(%arg0: i32, %arg1: i32) -> (i32, i32) {
    %c0_i32 = arith.constant 0 : i32
    %c0_i32_0 = arith.constant 0 : i32
    %c0_i32_1 = arith.constant 0 : i32
    return %c0_i32, %c0_i32_0 : i32, i32
  }
  func.func @transform_7(%arg0: i32, %arg1: i32) -> (i32, i32) {
    %c0_i32 = arith.constant 0 : i32
    %c0_i32_0 = arith.constant 0 : i32
    return %arg0, %c0_i32 : i32, i32
  }
}

</mosaic_0001>

<bundles_post_ra>
// kernel: gcn_forward.4
= control target key start
LH: loop header
LB: loop body
LE: loop exit
PB: predicated region body
PF: predicated region fallthrough
CT: control target
= control target key end

     0   :  { %s670_s1 = inlined_call_operand.vmem [shape: bf16[128,128], index: 1, kind: input, shape index: {}]   ;;  %s671_s0 = inlined_call_operand.vmem [shape: bf16[128,128], index: 0, kind: input, shape index: {}]   ;;  %s672_s2 = inlined_call_operand.vmem [shape: bf16[128,128], index: 2, kind: output, shape index: {}]  }
   0x1   :  { %v567_v0 = vld [vmem:[%s670_s1] sm:$0xff]   ;;  %v568_v1 = vld [vmem:[%s670_s1 + $0x8] sm:$0xff]   ;;  %v569_v2 = vld [vmem:[%s670_s1 + $0x10] sm:$0xff]  }
   0x2   :  { %519 = vmatprep.subr.bf16.mxu0 %v567_v0  ;;  %551 = vmatprep.subr.bf16.mxu1 %v567_v0  ;;  %v570_v3 = vld [vmem:[%s670_s1 + $0x18] sm:$0xff]   ;;  %v575_v4 = vld [vmem:[%s671_s0] sm:$0xff]   ;;  %v572_v7 = vld [vmem:[%s670_s1 + $0x28] sm:$0xff]  }
   0x3   :  { %520 = vmatpush3.bf16.msra.mxu0 %v567_v0  ;;  %559 = vmatpush3.bf16.msra.mxu1 %v567_v0  ;;  %v576_v5 = vld [vmem:[%s671_s0 + $0x20] sm:$0xff]   ;;  %v573_v8 = vld [vmem:[%s670_s1 + $0x30] sm:$0xff]   ;;  %v574_v9 = vld [vmem:[%s670_s1 + $0x38] sm:$0xff]  }
   0x4   :  { %521 = vmatprep.subr.bf16.mxu0 %v568_v1  ;;  %552 = vmatprep.subr.bf16.mxu1 %v568_v1  ;;  %v571_v6 = vld [vmem:[%s670_s1 + $0x20] sm:$0xff]   ;;  %v577_v10 = vld [vmem:[%s671_s0 + $0x8] sm:$0xff]   ;;  %v579_v12 = vld [vmem:[%s671_s0 + $0x10] sm:$0xff]  }
   0x5   :  { %535 = vmatprep.mubr.bf16.mxu0 %v575_v4  ;;  %543 = vmatprep.mubr.bf16.mxu1 %v576_v5  ;;  %v578_v11 = vld [vmem:[%s671_s0 + $0x28] sm:$0xff]   ;;  %v580_v13 = vld [vmem:[%s671_s0 + $0x30] sm:$0xff]   ;;  %v581_v14 = vld [vmem:[%s671_s0 + $0x18] sm:$0xff]  }
   0x6   :  { %v582_v15 = vld [vmem:[%s671_s0 + $0x38] sm:$0xff]  }
   0x7   :  { %522 = vmatpush3.bf16.msra.mxu0 %v568_v1  ;;  %560 = vmatpush3.bf16.msra.mxu1 %v568_v1 }
   0x8   :  { %523 = vmatprep.subr.bf16.mxu0 %v569_v2  ;;  %553 = vmatprep.subr.bf16.mxu1 %v569_v2 }
   0xb   :  { %524 = vmatpush3.bf16.msra.mxu0 %v569_v2  ;;  %561 = vmatpush3.bf16.msra.mxu1 %v569_v2 }
   0xc   :  { %525 = vmatprep.subr.bf16.mxu0 %v570_v3  ;;  %554 = vmatprep.subr.bf16.mxu1 %v570_v3 }
   0xf   :  { %526 = vmatpush3.bf16.msra.mxu0 %v570_v3  ;;  %562 = vmatpush3.bf16.msra.mxu1 %v570_v3 }
  0x10   :  { %527 = vmatprep.subr.bf16.mxu0 %v571_v6  ;;  %555 = vmatprep.subr.bf16.mxu1 %v571_v6 }
  0x13   :  { %528 = vmatpush3.bf16.msra.mxu0 %v571_v6  ;;  %563 = vmatpush3.bf16.msra.mxu1 %v571_v6 }
  0x14   :  { %529 = vmatprep.subr.bf16.mxu0 %v572_v7  ;;  %556 = vmatprep.subr.bf16.mxu1 %v572_v7 }
  0x17   :  { %530 = vmatpush3.bf16.msra.mxu0 %v572_v7  ;;  %564 = vmatpush3.bf16.msra.mxu1 %v572_v7 }
  0x18   :  { %531 = vmatprep.subr.bf16.mxu0 %v573_v8  ;;  %557 = vmatprep.subr.bf16.mxu1 %v573_v8 }
  0x1b   :  { %532 = vmatpush3.bf16.msra.mxu0 %v573_v8  ;;  %565 = vmatpush3.bf16.msra.mxu1 %v573_v8 }
  0x1c   :  { %533 = vmatprep.subr.bf16.mxu0 %v574_v9  ;;  %558 = vmatprep.subr.bf16.mxu1 %v574_v9 }
  0x1f   :  { %534 = vmatpush3.bf16.msra.mxu0 %v574_v9  ;;  %566 = vmatpush3.bf16.msra.mxu1 %v574_v9 }
  0x22   :  { %536 = vmatmul.mubr.bf16.vlgmr.msra.gmra.mrb[0].mxu0 %v577_v10  ;;  %544 = vmatmul.mubr.bf16.vlgmr.msra.gmra.mrb[0].mxu1 %v578_v11 }
  0x23   :  { %539 = vmatprep.mubr.bf16.mxu0 %v579_v12  ;;  %547 = vmatprep.mubr.bf16.mxu1 %v580_v13 }
  0x2a   :  { %540 = vmatmul.mubr.bf16.gmra.mrb[4].mxu0 %v581_v14  ;;  %548 = vmatmul.mubr.bf16.gmra.mrb[4].mxu1 %v582_v15 }
  0xf5   :  { %v537_v16 = vpop.f32.mrb[0].mxu0  ;;  %v545_v17 = vpop.f32.mrb[0].mxu1 }
  0xf6   :  { %v210_v18 = vpop.f32.mrb[1].mxu0  ;;  %v242_v19 = vpop.f32.mrb[1].mxu1 }
  0xf7   :  { %v538_v20 = vpop.f32.mrb[2].mxu0  ;;  %v546_v21 = vpop.f32.mrb[2].mxu1 }
  0xf8   :  { %v464_v22 = vpack.c.bf16 %v538_v20, %v537_v16  ;;  %v484_v23 = vpack.c.bf16 %v546_v21, %v545_v17  ;;  %v213_v24 = vpop.f32.mrb[3].mxu0  ;;  %v245_v25 = vpop.f32.mrb[3].mxu1 }
  0xf9   :  { %v459_v26 = vpack.c.bf16 %v213_v24, %v210_v18  ;;  %v479_v27 = vpack.c.bf16 %v245_v25, %v242_v19 }
  0xfa   :  { %496 = vst [vmem:[%s672_s2 + $0x8] sm:$0xff] %v464_v22   ;;  %500 = vst [vmem:[%s672_s2 + $0x28] sm:$0xff] %v484_v23  }
  0xfb   :  { %460 = vst [vmem:[%s672_s2] sm:$0xff] %v459_v26   ;;  %499 = vst [vmem:[%s672_s2 + $0x20] sm:$0xff] %v479_v27  }
  0xfd   :  { %v541_v28 = vpop.f32.mrb[4].mxu0  ;;  %v549_v29 = vpop.f32.mrb[4].mxu1 }
  0xfe   :  { %v226_v30 = vpop.f32.mrb[5].mxu0  ;;  %v258_v31 = vpop.f32.mrb[5].mxu1 }
  0xff   :  { %v542_v32 = vpop.f32.mrb[6].mxu0  ;;  %v550_v33 = vpop.f32.mrb[6].mxu1 }
 0x100   :  { %v474_v34 = vpack.c.bf16 %v542_v32, %v541_v28  ;;  %v494_v35 = vpack.c.bf16 %v550_v33, %v549_v29  ;;  %v229_v36 = vpop.f32.mrb[7].mxu0  ;;  %v261_v37 = vpop.f32.mrb[7].mxu1 }
 0x101   :  { %v469_v38 = vpack.c.bf16 %v229_v36, %v226_v30  ;;  %v489_v39 = vpack.c.bf16 %v261_v37, %v258_v31 }
 0x102   :  { %498 = vst [vmem:[%s672_s2 + $0x18] sm:$0xff] %v474_v34   ;;  %502 = vst [vmem:[%s672_s2 + $0x38] sm:$0xff] %v494_v35  }
 0x103   :  { %497 = vst [vmem:[%s672_s2 + $0x10] sm:$0xff] %v469_v38   ;;  %501 = vst [vmem:[%s672_s2 + $0x30] sm:$0xff] %v489_v39  }

// kernel: gcn_forward.5
= control target key start
LH: loop header
LB: loop body
LE: loop exit
PB: predicated region body
PF: predicated region fallthrough
CT: control target
= control target key end

     0   :  { %s721_s1 = inlined_call_operand.vmem [shape: bf16[128,128], index: 1, kind: input, shape index: {}]   ;;  %s722_s0 = inlined_call_operand.vmem [shape: bf16[128,128], index: 0, kind: input, shape index: {}]   ;;  %s723_s2 = inlined_call_operand.vmem [shape: f32[1,128], index: 2, kind: input, shape index: {}]   ;;  %s724_s3 = inlined_call_operand.vmem [shape: bf16[128,128], index: 3, kind: output, shape index: {}]  }
   0x1   :  { %v610_v0 = vld [vmem:[%s721_s1] sm:$0xff]   ;;  %v611_v1 = vld [vmem:[%s721_s1 + $0x8] sm:$0xff]   ;;  %v612_v2 = vld [vmem:[%s721_s1 + $0x10] sm:$0xff]  }
   0x2   :  { %562 = vmatprep.subr.bf16.mxu0 %v610_v0  ;;  %594 = vmatprep.subr.bf16.mxu1 %v610_v0  ;;  %v613_v3 = vld [vmem:[%s721_s1 + $0x18] sm:$0xff]   ;;  %v618_v4 = vld [vmem:[%s722_s0] sm:$0xff]   ;;  %v615_v7 = vld [vmem:[%s721_s1 + $0x28] sm:$0xff]  }
   0x3   :  { %563 = vmatpush3.bf16.msra.mxu0 %v610_v0  ;;  %602 = vmatpush3.bf16.msra.mxu1 %v610_v0  ;;  %v619_v5 = vld [vmem:[%s722_s0 + $0x20] sm:$0xff]   ;;  %v616_v8 = vld [vmem:[%s721_s1 + $0x30] sm:$0xff]   ;;  %v617_v9 = vld [vmem:[%s721_s1 + $0x38] sm:$0xff]  }
   0x4   :  { %564 = vmatprep.subr.bf16.mxu0 %v611_v1  ;;  %595 = vmatprep.subr.bf16.mxu1 %v611_v1  ;;  %v614_v6 = vld [vmem:[%s721_s1 + $0x20] sm:$0xff]   ;;  %v620_v10 = vld [vmem:[%s722_s0 + $0x8] sm:$0xff]   ;;  %v622_v12 = vld [vmem:[%s722_s0 + $0x10] sm:$0xff]  }
   0x5   :  { %578 = vmatprep.mubr.bf16.mxu0 %v618_v4  ;;  %586 = vmatprep.mubr.bf16.mxu1 %v619_v5  ;;  %v621_v11 = vld [vmem:[%s722_s0 + $0x28] sm:$0xff]   ;;  %v623_v13 = vld [vmem:[%s722_s0 + $0x30] sm:$0xff]   ;;  %v624_v14 = vld [vmem:[%s722_s0 + $0x18] sm:$0xff]  }
   0x6   :  { %v625_v15 = vld [vmem:[%s722_s0 + $0x38] sm:$0xff]   ;;  %v466_v16 = vld [vmem:[%s723_s2] ss:$0 sm:$0xff] }
   0x7   :  { %565 = vmatpush3.bf16.msra.mxu0 %v611_v1  ;;  %603 = vmatpush3.bf16.msra.mxu1 %v611_v1 }
   0x8   :  { %566 = vmatprep.subr.bf16.mxu0 %v612_v2  ;;  %596 = vmatprep.subr.bf16.mxu1 %v612_v2 }
   0xb   :  { %567 = vmatpush3.bf16.msra.mxu0 %v612_v2  ;;  %604 = vmatpush3.bf16.msra.mxu1 %v612_v2 }
   0xc   :  { %568 = vmatprep.subr.bf16.mxu0 %v613_v3  ;;  %597 = vmatprep.subr.bf16.mxu1 %v613_v3 }
   0xf   :  { %569 = vmatpush3.bf16.msra.mxu0 %v613_v3  ;;  %605 = vmatpush3.bf16.msra.mxu1 %v613_v3 }
  0x10   :  { %570 = vmatprep.subr.bf16.mxu0 %v614_v6  ;;  %598 = vmatprep.subr.bf16.mxu1 %v614_v6 }
  0x13   :  { %571 = vmatpush3.bf16.msra.mxu0 %v614_v6  ;;  %606 = vmatpush3.bf16.msra.mxu1 %v614_v6 }
  0x14   :  { %572 = vmatprep.subr.bf16.mxu0 %v615_v7  ;;  %599 = vmatprep.subr.bf16.mxu1 %v615_v7 }
  0x17   :  { %573 = vmatpush3.bf16.msra.mxu0 %v615_v7  ;;  %607 = vmatpush3.bf16.msra.mxu1 %v615_v7 }
  0x18   :  { %574 = vmatprep.subr.bf16.mxu0 %v616_v8  ;;  %600 = vmatprep.subr.bf16.mxu1 %v616_v8 }
  0x1b   :  { %575 = vmatpush3.bf16.msra.mxu0 %v616_v8  ;;  %608 = vmatpush3.bf16.msra.mxu1 %v616_v8 }
  0x1c   :  { %576 = vmatprep.subr.bf16.mxu0 %v617_v9  ;;  %601 = vmatprep.subr.bf16.mxu1 %v617_v9 }
  0x1f   :  { %577 = vmatpush3.bf16.msra.mxu0 %v617_v9  ;;  %609 = vmatpush3.bf16.msra.mxu1 %v617_v9 }
  0x22   :  { %579 = vmatmul.mubr.bf16.vlgmr.msra.gmra.mrb[0].mxu0 %v620_v10  ;;  %587 = vmatmul.mubr.bf16.vlgmr.msra.gmra.mrb[0].mxu1 %v621_v11 }
  0x23   :  { %582 = vmatprep.mubr.bf16.mxu0 %v622_v12  ;;  %590 = vmatprep.mubr.bf16.mxu1 %v623_v13 }
  0x2a   :  { %583 = vmatmul.mubr.bf16.gmra.mrb[4].mxu0 %v624_v14  ;;  %591 = vmatmul.mubr.bf16.gmra.mrb[4].mxu1 %v625_v15 }
  0xf5   :  { %v580_v17 = vpop.f32.mrb[0].mxu0  ;;  %v588_v18 = vpop.f32.mrb[0].mxu1 }
  0xf6   :  { %v336_v19 = vadd.f32 %v580_v17, %v466_v16  ;;  %v344_v20 = vadd.f32 %v588_v18, %v466_v16  ;;  %v213_v21 = vpop.f32.mrb[1].mxu0  ;;  %v245_v22 = vpop.f32.mrb[1].mxu1 }
  0xf7   :  { %v334_v23 = vadd.f32 %v466_v16, %v213_v21  ;;  %v342_v24 = vadd.f32 %v466_v16, %v245_v22  ;;  %v581_v25 = vpop.f32.mrb[2].mxu0  ;;  %v589_v26 = vpop.f32.mrb[2].mxu1 }
  0xf8   :  { %v337_v27 = vadd.f32 %v581_v25, %v466_v16  ;;  %v345_v28 = vadd.f32 %v589_v26, %v466_v16  ;;  %v216_v29 = vpop.f32.mrb[3].mxu0  ;;  %v248_v30 = vpop.f32.mrb[3].mxu1  ;;  %v352_v33 = vmax.f32 %v336_v19, 0.0  ;;  %v360_v34 = vmax.f32 %v344_v20, 0.0 }
  0xf9   :  { %v335_v31 = vadd.f32 %v466_v16, %v216_v29  ;;  %v343_v32 = vadd.f32 %v466_v16, %v248_v30  ;;  %v350_v37 = vmax.f32 %v334_v23, 0.0  ;;  %v358_v38 = vmax.f32 %v342_v24, 0.0 }
  0xfa   :  { %v353_v35 = vmax.f32 %v337_v27, 0.0  ;;  %v361_v36 = vmax.f32 %v345_v28, 0.0 }
  0xfb   :  { %v351_v39 = vmax.f32 %v335_v31, 0.0  ;;  %v359_v40 = vmax.f32 %v343_v32, 0.0 }
  0xfc   :  { %v507_v41 = vpack.c.bf16 %v353_v35, %v352_v33  ;;  %v527_v42 = vpack.c.bf16 %v361_v36, %v360_v34 }
  0xfd   :  { %v502_v43 = vpack.c.bf16 %v351_v39, %v350_v37  ;;  %v522_v44 = vpack.c.bf16 %v359_v40, %v358_v38  ;;  %v584_v45 = vpop.f32.mrb[4].mxu0  ;;  %v592_v46 = vpop.f32.mrb[4].mxu1 }
  0xfe   :  { %539 = vst [vmem:[%s724_s3 + $0x8] sm:$0xff] %v507_v41   ;;  %543 = vst [vmem:[%s724_s3 + $0x28] sm:$0xff] %v527_v42   ;;  %v340_v47 = vadd.f32 %v584_v45, %v466_v16  ;;  %v348_v48 = vadd.f32 %v592_v46, %v466_v16  ;;  %v229_v49 = vpop.f32.mrb[5].mxu0  ;;  %v261_v50 = vpop.f32.mrb[5].mxu1 }
  0xff   :  { %503 = vst [vmem:[%s724_s3] sm:$0xff] %v502_v43   ;;  %542 = vst [vmem:[%s724_s3 + $0x20] sm:$0xff] %v522_v44   ;;  %v338_v51 = vadd.f32 %v466_v16, %v229_v49  ;;  %v346_v52 = vadd.f32 %v466_v16, %v261_v50  ;;  %v585_v53 = vpop.f32.mrb[6].mxu0  ;;  %v593_v54 = vpop.f32.mrb[6].mxu1 }
 0x100   :  { %v341_v55 = vadd.f32 %v585_v53, %v466_v16  ;;  %v349_v56 = vadd.f32 %v593_v54, %v466_v16  ;;  %v232_v57 = vpop.f32.mrb[7].mxu0  ;;  %v264_v58 = vpop.f32.mrb[7].mxu1  ;;  %v356_v61 = vmax.f32 %v340_v47, 0.0  ;;  %v364_v62 = vmax.f32 %v348_v48, 0.0 }
 0x101   :  { %v339_v59 = vadd.f32 %v466_v16, %v232_v57  ;;  %v347_v60 = vadd.f32 %v466_v16, %v264_v58  ;;  %v354_v1 = vmax.f32 %v338_v51, 0.0  ;;  %v362_v2 = vmax.f32 %v346_v52, 0.0 }
 0x102   :  { %v357_v63 = vmax.f32 %v341_v55, 0.0  ;;  %v365_v0 = vmax.f32 %v349_v56, 0.0 }
 0x103   :  { %v355_v3 = vmax.f32 %v339_v59, 0.0  ;;  %v363_v4 = vmax.f32 %v347_v60, 0.0 }
 0x104   :  { %v517_v5 = vpack.c.bf16 %v357_v63, %v356_v61  ;;  %v537_v6 = vpack.c.bf16 %v365_v0, %v364_v62 }
 0x105   :  { %v512_v7 = vpack.c.bf16 %v355_v3, %v354_v1  ;;  %v532_v8 = vpack.c.bf16 %v363_v4, %v362_v2 }
 0x106   :  { %541 = vst [vmem:[%s724_s3 + $0x18] sm:$0xff] %v517_v5   ;;  %545 = vst [vmem:[%s724_s3 + $0x38] sm:$0xff] %v537_v6  }
 0x107   :  { %540 = vst [vmem:[%s724_s3 + $0x10] sm:$0xff] %v512_v7   ;;  %544 = vst [vmem:[%s724_s3 + $0x30] sm:$0xff] %v532_v8  }

// kernel: gcn_forward.7
= control target key start
LH: loop header
LB: loop body
LE: loop exit
PB: predicated region body
PF: predicated region fallthrough
CT: control target
= control target key end

     0   :  { %s1536_s1 = inlined_call_operand.vmem [shape: bf16[128,128], index: 1, kind: input, shape index: {}]   ;;  %s1537_s0 = inlined_call_operand.vmem [shape: bf16[128,128], index: 0, kind: input, shape index: {}]   ;;  %s1538_s3 = inlined_call_operand.vmem [shape: bf16[128,128], index: 3, kind: input, shape index: {}]   ;;  %s1539_s5 = inlined_call_operand.vmem [shape: bf16[128,128], index: 5, kind: input, shape index: {}]   ;;  %s1540_s2 = inlined_call_operand.vmem [shape: f32[1,128], index: 2, kind: input, shape index: {}]   ;;  %s1541_s4 = inlined_call_operand.vmem [shape: f32[1,128], index: 4, kind: input, shape index: {}]   ;;  %s1542_s6 = inlined_call_operand.vmem [shape: f32[1,128], index: 6, kind: input, shape index: {}]   ;;  %s1543_s7 = inlined_call_operand.vmem [shape: f32[128,128], index: 7, kind: output, shape index: {}]  }
   0x1   :  { %v1124_v0 = vld [vmem:[%s1536_s1] sm:$0xff]   ;;  %v1125_v1 = vld [vmem:[%s1536_s1 + $0x8] sm:$0xff]   ;;  %v1126_v2 = vld [vmem:[%s1536_s1 + $0x10] sm:$0xff]  }
   0x2   :  { %1012 = vmatprep.subr.bf16.mxu0 %v1124_v0  ;;  %v1127_v3 = vld [vmem:[%s1536_s1 + $0x18] sm:$0xff]   ;;  %v1132_v4 = vld [vmem:[%s1537_s0] sm:$0xff]   ;;  %v1129_v6 = vld [vmem:[%s1536_s1 + $0x28] sm:$0xff]  }
   0x3   :  { %1013 = vmatpush3.bf16.msra.mxu0 %v1124_v0  ;;  %1028 = vmatprep.mubr.bf16.mxu0 %v1132_v4  ;;  %v1128_v5 = vld [vmem:[%s1536_s1 + $0x20] sm:$0xff]   ;;  %v1141_v8 = vld [vmem:[%s1538_s3 + $0x8] sm:$0xff]   ;;  %v1130_v9 = vld [vmem:[%s1536_s1 + $0x30] sm:$0xff]  }
   0x4   :  { %1014 = vmatprep.subr.bf16.mxu0 %v1125_v1  ;;  %v1140_v7 = vld [vmem:[%s1538_s3] sm:$0xff]   ;;  %v1142_v10 = vld [vmem:[%s1538_s3 + $0x10] sm:$0xff]   ;;  %v1131_v11 = vld [vmem:[%s1536_s1 + $0x38] sm:$0xff]  }
   0x5   :  { %1044 = vmatprep.subr.bf16.mxu1 %v1140_v7  ;;  %v1143_v12 = vld [vmem:[%s1538_s3 + $0x18] sm:$0xff]   ;;  %v1144_v13 = vld [vmem:[%s1538_s3 + $0x20] sm:$0xff]   ;;  %v1133_v14 = vld [vmem:[%s1537_s0 + $0x8] sm:$0xff]  }
   0x6   :  { %1045 = vmatpush3.bf16.msra.mxu1 %v1140_v7  ;;  %v1134_v15 = vld [vmem:[%s1537_s0 + $0x10] sm:$0xff]   ;;  %v1145_v16 = vld [vmem:[%s1538_s3 + $0x28] sm:$0xff]   ;;  %v1135_v17 = vld [vmem:[%s1537_s0 + $0x18] sm:$0xff]  }
   0x7   :  { %1015 = vmatpush3.bf16.msra.mxu0 %v1125_v1  ;;  %1046 = vmatprep.subr.bf16.mxu1 %v1141_v8  ;;  %v1136_v18 = vld [vmem:[%s1537_s0 + $0x20] sm:$0xff]   ;;  %v1137_v19 = vld [vmem:[%s1537_s0 + $0x28] sm:$0xff]   ;;  %v1138_v20 = vld [vmem:[%s1537_s0 + $0x30] sm:$0xff]  }
   0x8   :  { %1016 = vmatprep.subr.bf16.mxu0 %v1126_v2  ;;  %v1139_v21 = vld [vmem:[%s1537_s0 + $0x38] sm:$0xff]   ;;  %v1146_v22 = vld [vmem:[%s1538_s3 + $0x30] sm:$0xff]   ;;  %v1148_v24 = vld [vmem:[%s1539_s5] sm:$0xff]  }
   0x9   :  { %v1147_v23 = vld [vmem:[%s1538_s3 + $0x38] sm:$0xff]   ;;  %v1149_v25 = vld [vmem:[%s1539_s5 + $0x8] sm:$0xff]   ;;  %v1150_v26 = vld [vmem:[%s1539_s5 + $0x10] sm:$0xff]  }
   0xa   :  { %1047 = vmatpush3.bf16.msra.mxu1 %v1141_v8  ;;  %v1151_v27 = vld [vmem:[%s1539_s5 + $0x18] sm:$0xff]   ;;  %v1152_v28 = vld [vmem:[%s1539_s5 + $0x20] sm:$0xff]   ;;  %v1153_v29 = vld [vmem:[%s1539_s5 + $0x28] sm:$0xff]  }
   0xb   :  { %1017 = vmatpush3.bf16.msra.mxu0 %v1126_v2  ;;  %1048 = vmatprep.subr.bf16.mxu1 %v1142_v10  ;;  %v945_v31 = vld [vmem:[%s1540_s2] ss:$0 sm:$0xff]  ;;  %v1154_v7 = vld [vmem:[%s1539_s5 + $0x30] sm:$0xff]   ;;  %v1155_v8 = vld [vmem:[%s1539_s5 + $0x38] sm:$0xff]  }
   0xc   :  { %1018 = vmatprep.subr.bf16.mxu0 %v1127_v3 }
   0xe   :  { %1049 = vmatpush3.bf16.msra.mxu1 %v1142_v10 }
   0xf   :  { %1019 = vmatpush3.bf16.msra.mxu0 %v1127_v3  ;;  %1050 = vmatprep.subr.bf16.mxu1 %v1143_v12 }
  0x10   :  { %1020 = vmatprep.subr.bf16.mxu0 %v1128_v5 }
  0x12   :  { %1051 = vmatpush3.bf16.msra.mxu1 %v1143_v12 }
  0x13   :  { %1021 = vmatpush3.bf16.msra.mxu0 %v1128_v5  ;;  %1052 = vmatprep.subr.bf16.mxu1 %v1144_v13 }
  0x14   :  { %1022 = vmatprep.subr.bf16.mxu0 %v1129_v6 }
  0x16   :  { %1053 = vmatpush3.bf16.msra.mxu1 %v1144_v13 }
  0x17   :  { %1023 = vmatpush3.bf16.msra.mxu0 %v1129_v6  ;;  %1054 = vmatprep.subr.bf16.mxu1 %v1145_v16 }
  0x18   :  { %1024 = vmatprep.subr.bf16.mxu0 %v1130_v9 }
  0x1a   :  { %1055 = vmatpush3.bf16.msra.mxu1 %v1145_v16 }
  0x1b   :  { %1025 = vmatpush3.bf16.msra.mxu0 %v1130_v9  ;;  %1056 = vmatprep.subr.bf16.mxu1 %v1146_v22  ;;  %v946_v9 = vld [vmem:[%s1541_s4] ss:$0 sm:$0xff] }
  0x1c   :  { %1026 = vmatprep.subr.bf16.mxu0 %v1131_v11 }
  0x1e   :  { %1057 = vmatpush3.bf16.msra.mxu1 %v1146_v22 }
  0x1f   :  { %1027 = vmatpush3.bf16.msra.mxu0 %v1131_v11  ;;  %1058 = vmatprep.subr.bf16.mxu1 %v1147_v23 }
  0x20   :  { %1076 = vmatprep.subr.bf16.mxu0 %v1148_v24 }
  0x22   :  { %1029 = vmatmul.mubr.bf16.vlgmr.msra.gmra.mrb[0].mxu0 %v1133_v14  ;;  %1059 = vmatpush3.bf16.msra.mxu1 %v1147_v23 }
  0x23   :  { %1032 = vmatprep.mubr.bf16.mxu0 %v1134_v15  ;;  %1108 = vmatprep.subr.bf16.mxu1 %v1148_v24 }
  0x24   :  { %1077 = vmatpush3.bf16.msra.mxu0 %v1148_v24 }
  0x25   :  { %1078 = vmatprep.subr.bf16.mxu0 %v1149_v25 }
  0x28   :  { %1079 = vmatpush3.bf16.msra.mxu0 %v1149_v25 }
  0x29   :  { %1080 = vmatprep.subr.bf16.mxu0 %v1150_v26 }
  0x2a   :  { %1033 = vmatmul.mubr.bf16.gmra.mrb[4].mxu0 %v1135_v17 }
  0x2b   :  { %1036 = vmatprep.mubr.bf16.mxu0 %v1136_v18 }
  0x2c   :  { %1081 = vmatpush3.bf16.msra.mxu0 %v1150_v26 }
  0x2d   :  { %1082 = vmatprep.subr.bf16.mxu0 %v1151_v27 }
  0x30   :  { %1083 = vmatpush3.bf16.msra.mxu0 %v1151_v27 }
  0x31   :  { %1084 = vmatprep.subr.bf16.mxu0 %v1152_v28 }
  0x32   :  { %1037 = vmatmul.mubr.bf16.gmra.mrb[8].mxu0 %v1137_v19 }
  0x33   :  { %1040 = vmatprep.mubr.bf16.mxu0 %v1138_v20 }
  0x34   :  { %1085 = vmatpush3.bf16.msra.mxu0 %v1152_v28 }
  0x35   :  { %1086 = vmatprep.subr.bf16.mxu0 %v1153_v29 }
  0x38   :  { %1087 = vmatpush3.bf16.msra.mxu0 %v1153_v29 }
  0x39   :  { %1088 = vmatprep.subr.bf16.mxu0 %v1154_v7 }
  0x3a   :  { %1041 = vmatmul.mubr.bf16.gmra.mrb[12].mxu0 %v1139_v21 }
  0x3c   :  { %1089 = vmatpush3.bf16.msra.mxu0 %v1154_v7 }
  0x3d   :  { %1090 = vmatprep.subr.bf16.mxu0 %v1155_v8 }
  0x40   :  { %1091 = vmatpush3.bf16.msra.mxu0 %v1155_v8 }
  0xf5   :  { %v1030_v30 = vpop.f32.mrb[0].mxu0 }
  0xf6   :  { %v225_v32 = vpop.f32.mrb[1].mxu0  ;;  %v348_v34 = vadd.f32 %v1030_v30, %v945_v31 }
  0xf7   :  { %v1031_v33 = vpop.f32.mrb[2].mxu0  ;;  %v346_v37 = vadd.f32 %v945_v31, %v225_v32 }
  0xf8   :  { %v349_v35 = vadd.f32 %v1031_v33, %v945_v31  ;;  %v228_v36 = vpop.f32.mrb[3].mxu0 }
  0xf9   :  { %v347_v38 = vadd.f32 %v945_v31, %v228_v36 }
  0xfa   :  { %v363_v39 = vpack.c.bf16 %v349_v35, %v348_v34 }
  0xfb   :  { %v362_v40 = vpack.c.bf16 %v347_v38, %v346_v37 }
  0xfd   :  { %v1034_v41 = vpop.f32.mrb[4].mxu0  ;;  %1060 = vmatprep.mubr.bf16.mxu1 %v362_v40 }
  0xfe   :  { %v352_v42 = vadd.f32 %v1034_v41, %v945_v31  ;;  %v241_v43 = vpop.f32.mrb[5].mxu0  ;;  %1061 = vmatmul.mubr.bf16.vlgmr.msra.gmra.mrb[0].mxu1 %v363_v39 }
  0xff   :  { %v1035_v44 = vpop.f32.mrb[6].mxu0  ;;  %1116 = vmatpush3.bf16.msra.mxu1 %v1148_v24  ;;  %v350_v47 = vadd.f32 %v945_v31, %v241_v43 }
 0x100   :  { %v353_v45 = vadd.f32 %v1035_v44, %v945_v31  ;;  %v244_v46 = vpop.f32.mrb[7].mxu0  ;;  %1109 = vmatprep.subr.bf16.mxu1 %v1149_v25 }
 0x101   :  { %v351_v48 = vadd.f32 %v945_v31, %v244_v46 }
 0x102   :  { %v365_v49 = vpack.c.bf16 %v353_v45, %v352_v42 }
 0x103   :  { %v364_v50 = vpack.c.bf16 %v351_v48, %v350_v47  ;;  %1117 = vmatpush3.bf16.msra.mxu1 %v1149_v25 }
 0x104   :  { %1110 = vmatprep.subr.bf16.mxu1 %v1150_v26 }
 0x105   :  { %v1038_v51 = vpop.f32.mrb[8].mxu0  ;;  %1064 = vmatprep.mubr.bf16.mxu1 %v364_v50 }
 0x106   :  { %v356_v52 = vadd.f32 %v1038_v51, %v945_v31  ;;  %v257_v53 = vpop.f32.mrb[9].mxu0  ;;  %1065 = vmatmul.mubr.bf16.gmra.mrb[4].mxu1 %v365_v49 }
 0x107   :  { %v1039_v54 = vpop.f32.mrb[10].mxu0  ;;  %1118 = vmatpush3.bf16.msra.mxu1 %v1150_v26  ;;  %v354_v57 = vadd.f32 %v945_v31, %v257_v53 }
 0x108   :  { %v357_v55 = vadd.f32 %v1039_v54, %v945_v31  ;;  %v260_v56 = vpop.f32.mrb[11].mxu0  ;;  %1111 = vmatprep.subr.bf16.mxu1 %v1151_v27 }
 0x109   :  { %v355_v58 = vadd.f32 %v945_v31, %v260_v56 }
 0x10a   :  { %v367_v59 = vpack.c.bf16 %v357_v55, %v356_v52 }
 0x10b   :  { %v366_v60 = vpack.c.bf16 %v355_v58, %v354_v57  ;;  %1119 = vmatpush3.bf16.msra.mxu1 %v1151_v27 }
 0x10c   :  { %1112 = vmatprep.subr.bf16.mxu1 %v1152_v28 }
 0x10d   :  { %v1042_v61 = vpop.f32.mrb[12].mxu0  ;;  %1068 = vmatprep.mubr.bf16.mxu1 %v366_v60 }
 0x10e   :  { %v360_v62 = vadd.f32 %v1042_v61, %v945_v31  ;;  %v273_v63 = vpop.f32.mrb[13].mxu0  ;;  %1069 = vmatmul.mubr.bf16.gmra.mrb[8].mxu1 %v367_v59 }
 0x10f   :  { %v1043_v0 = vpop.f32.mrb[14].mxu0  ;;  %1120 = vmatpush3.bf16.msra.mxu1 %v1152_v28  ;;  %v358_v3 = vadd.f32 %v945_v31, %v273_v63 }
 0x110   :  { %v361_v1 = vadd.f32 %v1043_v0, %v945_v31  ;;  %v276_v2 = vpop.f32.mrb[15].mxu0  ;;  %1113 = vmatprep.subr.bf16.mxu1 %v1153_v29 }
 0x111   :  { %v359_v4 = vadd.f32 %v945_v31, %v276_v2  ;;  %v730_v2 = vlaneseq }
 0x112   :  { %v369_v5 = vpack.c.bf16 %v361_v1, %v360_v62 }
 0x113   :  { %v368_v6 = vpack.c.bf16 %v359_v4, %v358_v3  ;;  %1121 = vmatpush3.bf16.msra.mxu1 %v1153_v29  ;;  %v1362_v3 = vand.u32 127, %v730_v2  ;;  %v955_v4 = vld [vmem:[%s1542_s6] ss:$0 sm:$0xff] }
 0x114   :  { %1114 = vmatprep.subr.bf16.mxu1 %v1154_v7 }
 0x115   :  { %1072 = vmatprep.mubr.bf16.mxu1 %v368_v6  ;;  %vm732_vm0 = vcmp.lt.s32.totalorder %v1362_v3, 4 }
 0x116   :  { %1073 = vmatmul.mubr.bf16.gmra.mrb[12].mxu1 %v369_v5 }
 0x117   :  { %1122 = vmatpush3.bf16.msra.mxu1 %v1154_v7 }
 0x118   :  { %1115 = vmatprep.subr.bf16.mxu1 %v1155_v8 }
 0x11b   :  { %1123 = vmatpush3.bf16.msra.mxu1 %v1155_v8 }
 0x1d1   :  { %v1062_v10 = vpop.f32.mrb[0].mxu1 }
 0x1d2   :  { %v484_v11 = vadd.f32 %v1062_v10, %v946_v9  ;;  %v475_v12 = vpop.f32.mrb[1].mxu1 }
 0x1d3   :  { %v476_v13 = vadd.f32 %v946_v9, %v475_v12  ;;  %v1063_v14 = vpop.f32.mrb[2].mxu1 }
 0x1d4   :  { %v487_v15 = vadd.f32 %v1063_v14, %v946_v9  ;;  %v478_v16 = vpop.f32.mrb[3].mxu1  ;;  %v540_v18 = vmax.f32 %v484_v11, 0.0 }
 0x1d5   :  { %v479_v17 = vadd.f32 %v946_v9, %v478_v16  ;;  %v538_v20 = vmax.f32 %v476_v13, 0.0 }
 0x1d6   :  { %v541_v19 = vmax.f32 %v487_v15, 0.0 }
 0x1d7   :  { %v539_v21 = vmax.f32 %v479_v17, 0.0 }
 0x1d8   :  { %v555_v22 = vpack.c.bf16 %v541_v19, %v540_v18 }
 0x1d9   :  { %v554_v23 = vpack.c.bf16 %v539_v21, %v538_v20  ;;  %v1066_v24 = vpop.f32.mrb[4].mxu1 }
 0x1da   :  { %v500_v25 = vadd.f32 %v1066_v24, %v946_v9  ;;  %v491_v26 = vpop.f32.mrb[5].mxu1 }
 0x1db   :  { %v492_v27 = vadd.f32 %v946_v9, %v491_v26  ;;  %v1067_v28 = vpop.f32.mrb[6].mxu1  ;;  %1092 = vmatprep.mubr.bf16.mxu0 %v554_v23 }
 0x1dc   :  { %v503_v29 = vadd.f32 %v1067_v28, %v946_v9  ;;  %v494_v30 = vpop.f32.mrb[7].mxu1  ;;  %1093 = vmatmul.mubr.bf16.vlgmr.msra.gmra.mrb[16].mxu0 %v555_v22  ;;  %v544_v32 = vmax.f32 %v500_v25, 0.0 }
 0x1dd   :  { %v495_v31 = vadd.f32 %v946_v9, %v494_v30  ;;  %v542_v34 = vmax.f32 %v492_v27, 0.0 }
 0x1de   :  { %v545_v33 = vmax.f32 %v503_v29, 0.0 }
 0x1df   :  { %v543_v35 = vmax.f32 %v495_v31, 0.0 }
 0x1e0   :  { %v557_v36 = vpack.c.bf16 %v545_v33, %v544_v32 }
 0x1e1   :  { %v556_v37 = vpack.c.bf16 %v543_v35, %v542_v34  ;;  %v1070_v38 = vpop.f32.mrb[8].mxu1 }
 0x1e2   :  { %v516_v39 = vadd.f32 %v1070_v38, %v946_v9  ;;  %v507_v40 = vpop.f32.mrb[9].mxu1 }
 0x1e3   :  { %v508_v41 = vadd.f32 %v946_v9, %v507_v40  ;;  %v1071_v42 = vpop.f32.mrb[10].mxu1  ;;  %1096 = vmatprep.mubr.bf16.mxu0 %v556_v37 }
 0x1e4   :  { %v519_v43 = vadd.f32 %v1071_v42, %v946_v9  ;;  %v510_v44 = vpop.f32.mrb[11].mxu1  ;;  %1097 = vmatmul.mubr.bf16.gmra.mrb[20].mxu0 %v557_v36  ;;  %v548_v46 = vmax.f32 %v516_v39, 0.0 }
 0x1e5   :  { %v511_v45 = vadd.f32 %v946_v9, %v510_v44  ;;  %v546_v48 = vmax.f32 %v508_v41, 0.0 }
 0x1e6   :  { %v549_v47 = vmax.f32 %v519_v43, 0.0 }
 0x1e7   :  { %v547_v49 = vmax.f32 %v511_v45, 0.0 }
 0x1e8   :  { %v559_v50 = vpack.c.bf16 %v549_v47, %v548_v46 }
 0x1e9   :  { %v558_v51 = vpack.c.bf16 %v547_v49, %v546_v48  ;;  %v1074_v52 = vpop.f32.mrb[12].mxu1 }
 0x1ea   :  { %v532_v53 = vadd.f32 %v1074_v52, %v946_v9  ;;  %v523_v54 = vpop.f32.mrb[13].mxu1 }
 0x1eb   :  { %v524_v55 = vadd.f32 %v946_v9, %v523_v54  ;;  %v1075_v56 = vpop.f32.mrb[14].mxu1  ;;  %1100 = vmatprep.mubr.bf16.mxu1 %v558_v51 }
 0x1ec   :  { %v535_v57 = vadd.f32 %v1075_v56, %v946_v9  ;;  %v526_v58 = vpop.f32.mrb[15].mxu1  ;;  %1101 = vmatmul.mubr.bf16.vlgmr.msra.gmra.mrb[16].mxu1 %v559_v50  ;;  %v552_v60 = vmax.f32 %v532_v53, 0.0 }
 0x1ed   :  { %v527_v59 = vadd.f32 %v946_v9, %v526_v58  ;;  %v550_v62 = vmax.f32 %v524_v55, 0.0 }
 0x1ee   :  { %v553_v61 = vmax.f32 %v535_v57, 0.0 }
 0x1ef   :  { %v551_v63 = vmax.f32 %v527_v59, 0.0 }
 0x1f0   :  { %v561_v0 = vpack.c.bf16 %v553_v61, %v552_v60 }
 0x1f1   :  { %v560_v1 = vpack.c.bf16 %v551_v63, %v550_v62 }
 0x1f3   :  { %1104 = vmatprep.mubr.bf16.mxu1 %v560_v1 }
 0x1f4   :  { %1105 = vmatmul.mubr.bf16.gmra.mrb[20].mxu1 %v561_v0 }
 0x2af   :  { %v1094_v5 = vpop.f32.mrb[16].mxu0 }
 0x2b0   :  { %v676_v6 = vadd.f32 %v1094_v5, %v955_v4  ;;  %v667_v7 = vpop.f32.mrb[17].mxu0 }
 0x2b1   :  { %v668_v8 = vadd.f32 %v955_v4, %v667_v7  ;;  %v1095_v9 = vpop.f32.mrb[18].mxu0 }
 0x2b2   :  { %v679_v10 = vadd.f32 %v1095_v9, %v955_v4  ;;  %v670_v11 = vpop.f32.mrb[19].mxu0  ;;  %v735_v12 = vsel %vm732_vm0, %v676_v6, -1e+30 }
 0x2b3   :  { %v671_v13 = vadd.f32 %v955_v4, %v670_v11  ;;  %753 = vmax.xlane.f32.xlu1 %v735_v12  ;;  %v733_v14 = vsel %vm732_vm0, %v668_v8, -1e+30 }
 0x2b4   :  { %749 = vmax.xlane.f32.xlu0 %v733_v14  ;;  %v736_v15 = vsel %vm732_vm0, %v679_v10, -1e+30 }
 0x2b5   :  { %v734_v17 = vsel %vm732_vm0, %v671_v13, -1e+30 }
 0x2b7   :  { %755 = vmax.xlane.f32.xlu1 %v736_v15  ;;  %v1098_v16 = vpop.f32.mrb[20].mxu0 }
 0x2b8   :  { %v692_v18 = vadd.f32 %v1098_v16, %v955_v4  ;;  %v683_v19 = vpop.f32.mrb[21].mxu0  ;;  %751 = vmax.xlane.f32.xlu0 %v734_v17 }
 0x2b9   :  { %v1099_v20 = vpop.f32.mrb[22].mxu0  ;;  %v684_v24 = vadd.f32 %v955_v4, %v683_v19 }
 0x2ba   :  { %v695_v21 = vadd.f32 %v1099_v20, %v955_v4  ;;  %v686_v22 = vpop.f32.mrb[23].mxu0  ;;  %v739_v23 = vsel %vm732_vm0, %v692_v18, -1e+30 }
 0x2bb   :  { %v687_v25 = vadd.f32 %v955_v4, %v686_v22  ;;  %v737_v28 = vsel %vm732_vm0, %v684_v24, -1e+30 }
 0x2bc   :  { %761 = vmax.xlane.f32.xlu0 %v739_v23  ;;  %v740_v26 = vsel %vm732_vm0, %v695_v21, -1e+30 }
 0x2bd   :  { %763 = vmax.xlane.f32.xlu1 %v740_v26  ;;  %v738_v31 = vsel %vm732_vm0, %v687_v25, -1e+30 }
 0x2bf   :  { %v1102_v27 = vpop.f32.mrb[16].mxu1 }
 0x2c0   :  { %v708_v29 = vadd.f32 %v1102_v27, %v955_v4  ;;  %757 = vmax.xlane.f32.xlu0 %v737_v28  ;;  %v699_v30 = vpop.f32.mrb[17].mxu1 }
 0x2c1   :  { %759 = vmax.xlane.f32.xlu1 %v738_v31  ;;  %v1103_v32 = vpop.f32.mrb[18].mxu1  ;;  %v700_v36 = vadd.f32 %v955_v4, %v699_v30 }
 0x2c2   :  { %v711_v33 = vadd.f32 %v1103_v32, %v955_v4  ;;  %v702_v34 = vpop.f32.mrb[19].mxu1  ;;  %v743_v35 = vsel %vm732_vm0, %v708_v29, -1e+30 }
 0x2c3   :  { %v703_v37 = vadd.f32 %v955_v4, %v702_v34  ;;  %v1390_v40 = vsel %vm732_vm0, %v700_v36, -1e+30 }
 0x2c4   :  { %769 = vmax.xlane.f32.xlu0 %v743_v35  ;;  %v744_v38 = vsel %vm732_vm0, %v711_v33, -1e+30 }
 0x2c5   :  { %771 = vmax.xlane.f32.xlu1 %v744_v38  ;;  %v1395_v42 = vsel %vm732_vm0, %v703_v37, -1e+30 }
 0x2c7   :  { %v1106_v39 = vpop.f32.mrb[20].mxu1 }
 0x2c8   :  { %765 = vmax.xlane.f32.xlu0 %v1390_v40  ;;  %v715_v41 = vpop.f32.mrb[21].mxu1  ;;  %v724_v46 = vadd.f32 %v1106_v39, %v955_v4 }
 0x2c9   :  { %v716_v43 = vadd.f32 %v955_v4, %v715_v41  ;;  %767 = vmax.xlane.f32.xlu1 %v1395_v42  ;;  %v1107_v44 = vpop.f32.mrb[22].mxu1 }
 0x2ca   :  { %v718_v45 = vpop.f32.mrb[23].mxu1  ;;  %v727_v49 = vadd.f32 %v1107_v44, %v955_v4  ;;  %v1410_v51 = vsel %vm732_vm0, %v724_v46, -1e+30 }
 0x2cb   :  { %v719_v47 = vadd.f32 %v955_v4, %v718_v45  ;;  %v1400_v48 = vsel %vm732_vm0, %v716_v43, -1e+30 }
 0x2cc   :  { %773 = vmax.xlane.f32.xlu0 %v1400_v48  ;;  %v1415_v52 = vsel %vm732_vm0, %v727_v49, -1e+30 }
 0x2cd   :  { %v1405_v50 = vsel %vm732_vm0, %v719_v47, -1e+30 }
 0x2ce   :  { %775 = vmax.xlane.f32.xlu1 %v1405_v50 }
 0x2d0   :  { %777 = vmax.xlane.f32.xlu0 %v1410_v51 }
 0x2d2   :  { %779 = vmax.xlane.f32.xlu1 %v1415_v52 }
 0x340   :  { %v754_v53 = vpop.xlane.xlu1 %753 }
 0x341   :  { %v1418_v54 = vsub.f32 %v735_v12, %v754_v53  ;;  %v750_v55 = vpop.xlane.xlu0 %749 }
 0x342   :  { %v1420_v56 = vsub.f32 %v733_v14, %v750_v55 }
 0x343   :  { %v801_v57 = vmul.f32 1.442695, %v1418_v54 }
 0x344   :  { %v797_v58 = vmul.f32 1.442695, %v1420_v56  ;;  %v756_v59 = vpop.xlane.xlu1 %755 }
 0x345   :  { %1156 = vpow2.f32 %v801_v57  ;;  %v1424_v60 = vsub.f32 %v736_v15, %v756_v59  ;;  %v752_v61 = vpop.xlane.xlu0 %751 }
 0x346   :  { %v1426_v62 = vsub.f32 %v734_v17, %v752_v61  ;;  %1158 = vpow2.f32 %v797_v58 }
 0x347   :  { %v803_v63 = vmul.f32 1.442695, %v1424_v60 }
 0x348   :  { %v799_v0 = vmul.f32 1.442695, %v1426_v62 }
 0x349   :  { %1160 = vpow2.f32 %v803_v63  ;;  %v762_v1 = vpop.xlane.xlu0 %761 }
 0x34a   :  { %v1430_v2 = vsub.f32 %v739_v23, %v762_v1  ;;  %v764_v3 = vpop.xlane.xlu1 %763  ;;  %1162 = vpow2.f32 %v799_v0 }
 0x34b   :  { %v1432_v4 = vsub.f32 %v740_v26, %v764_v3 }
 0x34c   :  { %v809_v5 = vmul.f32 1.442695, %v1430_v2 }
 0x34d   :  { %v811_v6 = vmul.f32 1.442695, %v1432_v4  ;;  %v758_v7 = vpop.xlane.xlu0 %757 }
 0x34e   :  { %1164 = vpow2.f32 %v809_v5  ;;  %v1436_v8 = vsub.f32 %v737_v28, %v758_v7  ;;  %v760_v9 = vpop.xlane.xlu1 %759 }
 0x34f   :  { %v1157_v10 = vpop.eup %1156  ;;  %v1438_v11 = vsub.f32 %v738_v31, %v760_v9  ;;  %1166 = vpow2.f32 %v811_v6 }
 0x350   :  { %v805_v12 = vmul.f32 1.442695, %v1436_v8  ;;  %833 = vadd.xlane.f32.xlu0 %v1157_v10  ;;  %v1159_v15 = vpop.eup %1158 }
 0x351   :  { %v807_v13 = vmul.f32 1.442695, %v1438_v11  ;;  %v770_v14 = vpop.xlane.xlu0 %769 }
 0x352   :  { %1168 = vpow2.f32 %v805_v12  ;;  %v1442_v16 = vsub.f32 %v743_v35, %v770_v14  ;;  %v772_v17 = vpop.xlane.xlu1 %771 }
 0x353   :  { %v1161_v18 = vpop.eup %1160  ;;  %v1444_v19 = vsub.f32 %v744_v38, %v772_v17  ;;  %1170 = vpow2.f32 %v807_v13 }
 0x354   :  { %v817_v20 = vmul.f32 1.442695, %v1442_v16  ;;  %835 = vadd.xlane.f32.xlu1 %v1161_v18  ;;  %829 = vadd.xlane.f32.xlu0 %v1159_v15  ;;  %v1163_v25 = vpop.eup %1162 }
 0x355   :  { %v819_v21 = vmul.f32 1.442695, %v1444_v19  ;;  %v766_v22 = vpop.xlane.xlu0 %765 }
 0x356   :  { %1172 = vpow2.f32 %v817_v20  ;;  %v1449_v23 = vsub.f32 %v1390_v40, %v766_v22  ;;  %v768_v24 = vpop.xlane.xlu1 %767 }
 0x357   :  { %v1452_v26 = vsub.f32 %v1395_v42, %v768_v24  ;;  %1174 = vpow2.f32 %v819_v21 }
 0x358   :  { %v1165_v27 = vpop.eup %1164  ;;  %v813_v28 = vmul.f32 1.442695, %v1449_v23  ;;  %831 = vadd.xlane.f32.xlu1 %v1163_v25 }
 0x359   :  { %v815_v29 = vmul.f32 1.442695, %v1452_v26  ;;  %841 = vadd.xlane.f32.xlu0 %v1165_v27  ;;  %v774_v30 = vpop.xlane.xlu0 %773  ;;  %v1167_v32 = vpop.eup %1166 }
 0x35a   :  { %1176 = vpow2.f32 %v813_v28  ;;  %v1457_v31 = vsub.f32 %v1400_v48, %v774_v30 }
 0x35b   :  { %v776_v33 = vpop.xlane.xlu1 %775  ;;  %1178 = vpow2.f32 %v815_v29 }
 0x35c   :  { %v1169_v34 = vpop.eup %1168  ;;  %v821_v35 = vmul.f32 1.442695, %v1457_v31  ;;  %v1461_v36 = vsub.f32 %v1405_v50, %v776_v33  ;;  %843 = vadd.xlane.f32.xlu1 %v1167_v32 }
 0x35d   :  { %837 = vadd.xlane.f32.xlu0 %v1169_v34  ;;  %v778_v37 = vpop.xlane.xlu0 %777  ;;  %v1171_v40 = vpop.eup %1170 }
 0x35e   :  { %1180 = vpow2.f32 %v821_v35  ;;  %v823_v38 = vmul.f32 1.442695, %v1461_v36  ;;  %v1465_v39 = vsub.f32 %v1410_v51, %v778_v37 }
 0x35f   :  { %v780_v41 = vpop.xlane.xlu1 %779 }
 0x360   :  { %v1173_v42 = vpop.eup %1172  ;;  %1182 = vpow2.f32 %v823_v38  ;;  %v825_v43 = vmul.f32 1.442695, %v1465_v39  ;;  %v1469_v44 = vsub.f32 %v1415_v52, %v780_v41  ;;  %839 = vadd.xlane.f32.xlu1 %v1171_v40 }
 0x361   :  { %849 = vadd.xlane.f32.xlu0 %v1173_v42  ;;  %v1175_v46 = vpop.eup %1174 }
 0x362   :  { %1184 = vpow2.f32 %v825_v43  ;;  %v827_v45 = vmul.f32 1.442695, %v1469_v44 }
 0x364   :  { %v1177_v47 = vpop.eup %1176  ;;  %1186 = vpow2.f32 %v827_v45  ;;  %851 = vadd.xlane.f32.xlu1 %v1175_v46 }
 0x365   :  { %845 = vadd.xlane.f32.xlu0 %v1177_v47  ;;  %v1179_v48 = vpop.eup %1178 }
 0x368   :  { %v1181_v49 = vpop.eup %1180  ;;  %847 = vadd.xlane.f32.xlu1 %v1179_v48 }
 0x369   :  { %853 = vadd.xlane.f32.xlu0 %v1181_v49 }
 0x36a   :  { %v1183_v50 = vpop.eup %1182 }
 0x36c   :  { %v1185_v51 = vpop.eup %1184  ;;  %855 = vadd.xlane.f32.xlu1 %v1183_v50 }
 0x36d   :  { %857 = vadd.xlane.f32.xlu0 %v1185_v51 }
 0x36e   :  { %v1187_v52 = vpop.eup %1186 }
 0x370   :  { %859 = vadd.xlane.f32.xlu1 %v1187_v52 }
 0x3dd   :  { %v834_v53 = vpop.xlane.xlu0 %833 }
 0x3de   :  { %1188 = vlog2.f32 %v834_v53 }
 0x3e1   :  { %v836_v55 = vpop.xlane.xlu1 %835  ;;  %v830_v57 = vpop.xlane.xlu0 %829 }
 0x3e2   :  { %1190 = vlog2.f32 %v836_v55 }
 0x3e3   :  { %1192 = vlog2.f32 %v830_v57 }
 0x3e5   :  { %v832_v58 = vpop.xlane.xlu1 %831 }
 0x3e6   :  { %1194 = vlog2.f32 %v832_v58  ;;  %v842_v59 = vpop.xlane.xlu0 %841 }
 0x3e7   :  { %1196 = vlog2.f32 %v842_v59 }
 0x3e8   :  { %v1189_v61 = vpop.eup %1188 }
 0x3e9   :  { %v866_v63 = vmul.f32 0.6931472, %v1189_v61  ;;  %v844_v0 = vpop.xlane.xlu1 %843 }
 0x3ea   :  { %1198 = vlog2.f32 %v844_v0  ;;  %v838_v1 = vpop.xlane.xlu0 %837 }
 0x3eb   :  { %v895_v3 = vsub.f32 %v1418_v54, %v866_v63  ;;  %1200 = vlog2.f32 %v838_v1 }
 0x3ec   :  { %v1191_v5 = vpop.eup %1190 }
 0x3ed   :  { %v1193_v6 = vpop.eup %1192  ;;  %911 = vst [vmem:[%s1543_s7 + $0x10] sm:$0xff] %v895_v3  ;;  %v868_v7 = vmul.f32 0.6931472, %v1191_v5  ;;  %v840_v9 = vpop.xlane.xlu1 %839 }
 0x3ee   :  { %v862_v10 = vmul.f32 0.6931472, %v1193_v6  ;;  %1202 = vlog2.f32 %v840_v9  ;;  %v850_v12 = vpop.xlane.xlu0 %849 }
 0x3ef   :  { %v896_v13 = vsub.f32 %v1424_v60, %v868_v7  ;;  %1204 = vlog2.f32 %v850_v12 }
 0x3f0   :  { %v1195_v14 = vpop.eup %1194  ;;  %v893_v15 = vsub.f32 %v1420_v56, %v862_v10 }
 0x3f1   :  { %v1197_v17 = vpop.eup %1196  ;;  %912 = vst [vmem:[%s1543_s7 + $0x18] sm:$0xff] %v896_v13  ;;  %v864_v54 = vmul.f32 0.6931472, %v1195_v14  ;;  %v852_v18 = vpop.xlane.xlu1 %851 }
 0x3f2   :  { %909 = vst [vmem:[%s1543_s7] sm:$0xff] %v893_v15  ;;  %v874_v20 = vmul.f32 0.6931472, %v1197_v17  ;;  %1206 = vlog2.f32 %v852_v18  ;;  %v846_v21 = vpop.xlane.xlu0 %845 }
 0x3f3   :  { %v894_v60 = vsub.f32 %v1426_v62, %v864_v54  ;;  %1208 = vlog2.f32 %v846_v21 }
 0x3f4   :  { %v1199_v22 = vpop.eup %1198  ;;  %v899_v56 = vsub.f32 %v1430_v2, %v874_v20 }
 0x3f5   :  { %v1201_v24 = vpop.eup %1200  ;;  %910 = vst [vmem:[%s1543_s7 + $0x8] sm:$0xff] %v894_v60  ;;  %v876_v25 = vmul.f32 0.6931472, %v1199_v22  ;;  %v848_v27 = vpop.xlane.xlu1 %847 }
 0x3f6   :  { %915 = vst [vmem:[%s1543_s7 + $0x30] sm:$0xff] %v899_v56  ;;  %v870_v28 = vmul.f32 0.6931472, %v1201_v24  ;;  %1210 = vlog2.f32 %v848_v27  ;;  %v854_v29 = vpop.xlane.xlu0 %853 }
 0x3f7   :  { %v900_v62 = vsub.f32 %v1432_v4, %v876_v25  ;;  %1212 = vlog2.f32 %v854_v29 }
 0x3f8   :  { %v1203_v30 = vpop.eup %1202  ;;  %v897_v2 = vsub.f32 %v1436_v8, %v870_v28 }
 0x3f9   :  { %v1205_v32 = vpop.eup %1204  ;;  %916 = vst [vmem:[%s1543_s7 + $0x38] sm:$0xff] %v900_v62  ;;  %v872_v33 = vmul.f32 0.6931472, %v1203_v30  ;;  %v856_v34 = vpop.xlane.xlu1 %855 }
 0x3fa   :  { %913 = vst [vmem:[%s1543_s7 + $0x20] sm:$0xff] %v897_v2  ;;  %v882_v35 = vmul.f32 0.6931472, %v1205_v32  ;;  %1214 = vlog2.f32 %v856_v34  ;;  %v858_v37 = vpop.xlane.xlu0 %857 }
 0x3fb   :  { %v898_v4 = vsub.f32 %v1438_v11, %v872_v33  ;;  %1216 = vlog2.f32 %v858_v37 }
 0x3fc   :  { %v1207_v38 = vpop.eup %1206  ;;  %v903_v8 = vsub.f32 %v1442_v16, %v882_v35 }
 0x3fd   :  { %v1209_v40 = vpop.eup %1208  ;;  %914 = vst [vmem:[%s1543_s7 + $0x28] sm:$0xff] %v898_v4  ;;  %v884_v41 = vmul.f32 0.6931472, %v1207_v38  ;;  %v860_v42 = vpop.xlane.xlu1 %859 }
 0x3fe   :  { %919 = vst [vmem:[%s1543_s7 + $0x50] sm:$0xff] %v903_v8  ;;  %v878_v43 = vmul.f32 0.6931472, %v1209_v40  ;;  %1218 = vlog2.f32 %v860_v42 }
 0x3ff   :  { %v904_v45 = vsub.f32 %v1444_v19, %v884_v41 }
 0x400   :  { %v1211_v11 = vpop.eup %1210  ;;  %v901_v46 = vsub.f32 %v1449_v23, %v878_v43 }
 0x401   :  { %v1213_v47 = vpop.eup %1212  ;;  %920 = vst [vmem:[%s1543_s7 + $0x58] sm:$0xff] %v904_v45  ;;  %v880_v16 = vmul.f32 0.6931472, %v1211_v11 }
 0x402   :  { %917 = vst [vmem:[%s1543_s7 + $0x40] sm:$0xff] %v901_v46  ;;  %v886_v48 = vmul.f32 0.6931472, %v1213_v47 }
 0x403   :  { %v902_v49 = vsub.f32 %v1452_v26, %v880_v16 }
 0x404   :  { %v1215_v50 = vpop.eup %1214  ;;  %v905_v51 = vsub.f32 %v1457_v31, %v886_v48 }
 0x405   :  { %v1217_v19 = vpop.eup %1216  ;;  %918 = vst [vmem:[%s1543_s7 + $0x48] sm:$0xff] %v902_v49  ;;  %v888_v23 = vmul.f32 0.6931472, %v1215_v50 }
 0x406   :  { %921 = vst [vmem:[%s1543_s7 + $0x60] sm:$0xff] %v905_v51  ;;  %v890_v52 = vmul.f32 0.6931472, %v1217_v19 }
 0x407   :  { %v906_v53 = vsub.f32 %v1461_v36, %v888_v23 }
 0x408   :  { %v1219_v55 = vpop.eup %1218  ;;  %v907_v57 = vsub.f32 %v1465_v39, %v890_v52 }
 0x409   :  { %922 = vst [vmem:[%s1543_s7 + $0x68] sm:$0xff] %v906_v53  ;;  %v892_v26 = vmul.f32 0.6931472, %v1219_v55 }
 0x40a   :  { %923 = vst [vmem:[%s1543_s7 + $0x70] sm:$0xff] %v907_v57 }
 0x40b   :  { %v908_v31 = vsub.f32 %v1469_v44, %v892_v26 }
 0x40d   :  { %924 = vst [vmem:[%s1543_s7 + $0x78] sm:$0xff] %v908_v31 }

</bundles_post_ra>
